<compile_context>
chip_gen: v6e
topology: v6e:2x2x1
jax: 0.10.0
libtpu: 0.0.40
codegen_flags: <defaults>
</compile_context>

<pallas_src>
import functools

import jax
import jax.numpy as jnp
from jax.experimental import pallas as pl
from jax.experimental.pallas import tpu as pltpu


def _round_up(x, m):
    return ((x + m - 1) // m) * m


def _activation_dtype():
    """bf16 activations on v6e/v7x (native bf16 VPU); f32 on v5e and older."""
    try:
        dev = jax.devices()[0]
        if dev.platform != "tpu":
            return jnp.float32
        kind = dev.device_kind.lower()
    except Exception:
        return jnp.float32
    if any(v in kind for v in ("v2", "v3", "v4", "v5")):
        return jnp.float32
    return jnp.bfloat16


_ACT_DTYPE = _activation_dtype()


# ----------------------------------------------------------------------------
# Pallas kernel: fused im2col-GEMM + BN shift + ReLU (lane-dense packed output)
# ----------------------------------------------------------------------------
def _conv_mm_kernel(x_ref, w_ref, shift_ref, o_ref):
    # y = relu(x @ w + shift); the eval-mode BN scale is pre-folded into w.
    acc = jnp.dot(x_ref[...], w_ref[...], preferred_element_type=jnp.float32)
    o_ref[...] = jnp.maximum(acc + shift_ref[...], 0.0).astype(o_ref.dtype)


# ----------------------------------------------------------------------------
# One-time parameter folding / packing (runs eagerly at init, NOT per call)
# ----------------------------------------------------------------------------
def fold_conv_layer(p, *, eps=1e-5):
    w, b = p["w"], p["b"]
    gamma, beta, mean, var = p["gamma"], p["beta"], p["mean"], p["var"]
    cout, cin, kh, kw = w.shape
    assert kh == 3 and kw == 3 and 128 % cout == 0
    k = kh * kw * cin
    kp = _round_up(k, 16)            # clean bf16 tiling (layer1: 27 -> 32)
    pack = 128 // cout               # output pixels packed per 128-lane row

    scale = gamma / jnp.sqrt(var + eps)
    # Weight matrix matching patch ordering ((ky,kx) outer, cin inner), BN folded.
    w_mat = jnp.transpose(w, (2, 3, 1, 0)).reshape(k, cout) * scale[None, :]
    if kp != k:
        w_mat = jnp.pad(w_mat, ((0, kp - k), (0, 0)))
    shift = (b - mean) * scale + beta

    # Block-diagonal replication -> naturally 128-wide (lane-dense) output rows.
    w_big = jnp.zeros((pack * kp, 128), jnp.float32)
    for j in range(pack):
        w_big = w_big.at[j * kp:(j + 1) * kp, j * cout:(j + 1) * cout].set(w_mat)

    return dict(
        w_big=w_big.astype(jnp.bfloat16),
        shift=jnp.tile(shift.astype(jnp.float32), pack).reshape(1, 128),
        cout=cout, cin=cin, kp=kp, pack=pack,
    )


def fold_fc(fc1, fc2, pooled_shape):
    """Pre-transpose fc weights and permute fc1 columns so the NHWC flatten of the
    last pool output matches PyTorch's NCHW view(B, -1)."""
    H, W, C = pooled_shape
    h_i, w_i, c_i = jnp.meshgrid(jnp.arange(H), jnp.arange(W), jnp.arange(C),
                                 indexing="ij")
    perm = (c_i * (H * W) + h_i * W + w_i).reshape(-1)   # NHWC pos -> NCHW flat idx
    w1t = fc1["w"][:, perm].T.astype(jnp.float32)        # (H*W*C, 10)
    return dict(
        w1t=w1t,
        b1=fc1["b"].astype(jnp.float32).reshape(1, -1),
        w2t=fc2["w"].T.astype(jnp.float32),
        b2=fc2["b"].astype(jnp.float32).reshape(1, -1),
    )


def fold_params(params):
    return dict(
        layer1=fold_conv_layer(params["layer1"]),
        layer2=fold_conv_layer(params["layer2"]),
        layer3=fold_conv_layer(params["layer3"]),
        fc=fold_fc(params["fc1"], params["fc2"], pooled_shape=(3, 3, 64)),
    )


# ----------------------------------------------------------------------------
# Conv block: bf16 im2col (glue) + fused Pallas GEMM/BN/ReLU
# ----------------------------------------------------------------------------
def conv_bn_relu(x, layer, *, num_steps=1, out_dtype=jnp.float32):
    """Conv2d(k=3, stride=2, pad=0) + eval-mode BatchNorm2d + ReLU.
    x: (B, H, W, Cin) NHWC.  Returns (B, OH, OW, Cout) in out_dtype."""
    B, H, W, cin = x.shape
    cout, kp, pack = layer["cout"], layer["kp"], layer["pack"]
    assert cin == layer["cin"]
    OH = (H - 3) // 2 + 1
    OW = (W - 3) // 2 + 1
    M = B * OH * OW
    k = 9 * cin

    # im2col in bf16: cast the small pre-patch tensor once, then strided-slice.
    xb = x.astype(jnp.bfloat16)
    pieces = [xb[:, ky:ky + 2 * OH - 1:2, kx:kx + 2 * OW - 1:2, :]
              for ky in range(3) for kx in range(3)]
    if kp != k:  # K padding folded into the same concat (no separate pad copy).
        pieces.append(jnp.zeros((B, OH, OW, kp - k), jnp.bfloat16))
    patches = jnp.concatenate(pieces, axis=-1).reshape(M, kp)

    # Packed-row geometry: `pack` consecutive output pixels per 128-lane row.
    mp = pl.cdiv(M, pack)
    tile_p = _round_up(pl.cdiv(mp, num_steps), 16)
    steps = pl.cdiv(mp, tile_p)
    mp_pad = steps * tile_p
    m_pad = mp_pad * pack
    if m_pad != M:
        patches = jnp.pad(patches, ((0, m_pad - M), (0, 0)))
    x_packed = patches.reshape(mp_pad, pack * kp)   # contiguous -> free reshape

    out = pl.pallas_call(
        _conv_mm_kernel,
        out_shape=jax.ShapeDtypeStruct((mp_pad, 128), out_dtype),
        grid_spec=pltpu.PrefetchScalarGridSpec(
            num_scalar_prefetch=0,
            grid=(steps,),
            in_specs=[
                pl.BlockSpec((tile_p, pack * kp), lambda i: (i, 0)),
                pl.BlockSpec((pack * kp, 128), lambda i: (0, 0)),
                pl.BlockSpec((1, 128), lambda i: (0, 0)),
            ],
            out_specs=pl.BlockSpec((tile_p, 128), lambda i: (i, 0)),
        ),
        compiler_params=pltpu.CompilerParams(
            dimension_semantics=("parallel",)),
    )(x_packed, layer["w_big"], layer["shift"])

    # Unpack: (mp_pad,128) -> (m_pad,Cout) is a free reshape; drop padded rows
    # (relu(shift) garbage) BEFORE reshaping back to NHWC.
    return out.reshape(m_pad, cout)[:M].reshape(B, OH, OW, cout)


# ----------------------------------------------------------------------------
# MaxPool 2x2 (floor) and fc head — pure glue at these sizes, kept in XLA
# ----------------------------------------------------------------------------
def maxpool2x2(x):
    """MaxPool2d(2,2) floor mode.  XLA fuses the four strided corner slices and the
    maxes into a single fusion that reads x once (no materialized corner copies)."""
    ph, pw = x.shape[1] // 2, x.shape[2] // 2
    a = x[:, 0:2 * ph:2, 0:2 * pw:2, :]
    b = x[:, 0:2 * ph:2, 1:2 * pw:2, :]
    c = x[:, 1:2 * ph:2, 0:2 * pw:2, :]
    d = x[:, 1:2 * ph:2, 1:2 * pw:2, :]
    return jnp.maximum(jnp.maximum(a, b), jnp.maximum(c, d))


def fc_head(x_nhwc, fc):
    """relu(x @ w1 + b1) @ w2 + b2 on (B, 576) -> (B, 2); ~12 KFLOP, plain jnp."""
    B = x_nhwc.shape[0]
    x = x_nhwc.reshape(B, -1).astype(jnp.float32)   # fc1 columns pre-permuted to NHWC
    h = jnp.maximum(x @ fc["w1t"] + fc["b1"], 0.0)
    return h @ fc["w2t"] + fc["b2"]


# ----------------------------------------------------------------------------
# Forward
# ----------------------------------------------------------------------------
def simplenet_forward(folded, x_nchw):
    act_dt = _ACT_DTYPE
    x = jnp.transpose(x_nchw, (0, 2, 3, 1))          # NCHW (PyTorch) -> NHWC

    # layer1: ~24.6K GEMM rows -> 4 even parallel steps (2 per TC on v7x).
    x = conv_bn_relu(x, folded["layer1"], num_steps=4, out_dtype=act_dt)
    x = maxpool2x2(x)
    # layer2: 2 parallel steps (keeps both v7x TCs busy; neutral on v5e/v6e).
    x = conv_bn_relu(x, folded["layer2"], num_steps=2, out_dtype=act_dt)
    x = maxpool2x2(x)
    # layer3: tiny (36 packed rows) -> single step.
    x = conv_bn_relu(x, folded["layer3"], num_steps=1, out_dtype=act_dt)
    x = maxpool2x2(x)

    return fc_head(x, folded["fc"])


# ----------------------------------------------------------------------------
# Deterministic synthetic parameters (PyTorch layouts)
# ----------------------------------------------------------------------------
def init_params(key):
    def conv_block(key, cin, cout):
        kw_, kb_ = jax.random.split(key)
        fan_in = cin * 9
        w = jax.random.normal(kw_, (cout, cin, 3, 3), jnp.float32) / jnp.sqrt(fan_in)
        b = 0.01 * jax.random.normal(kb_, (cout,), jnp.float32)
        return dict(
            w=w, b=b,
            gamma=jnp.ones((cout,), jnp.float32),
            beta=jnp.zeros((cout,), jnp.float32),
            mean=jnp.zeros((cout,), jnp.float32),
            var=jnp.ones((cout,), jnp.float32),
        )

    def linear(key, fin, fout):
        kw_, kb_ = jax.random.split(key)
        w = jax.random.normal(kw_, (fout, fin), jnp.float32) / jnp.sqrt(fin)
        b = 0.01 * jax.random.normal(kb_, (fout,), jnp.float32)
        return dict(w=w, b=b)

    k1, k2, k3, k4, k5 = jax.random.split(key, 5)
    return dict(
        layer1=conv_block(k1, 3, 16),
        layer2=conv_block(k2, 16, 32),
        layer3=conv_block(k3, 32, 64),
        fc1=linear(k4, 3 * 3 * 64, 10),
        fc2=linear(k5, 10, 2),
    )


if __name__ == "__main__":
    key = jax.random.PRNGKey(0)
    k_param, k_x = jax.random.split(key)
    params = init_params(k_param)
    folded = fold_params(params)          # one-time eager weight folding / packing

    # fc1 expects 3*3*64 features -> 224x224 spatial input (as the module implies).
    x = jax.random.normal(k_x, (2, 3, 224, 224), jnp.float32)

    fwd = jax.jit(functools.partial(simplenet_forward, folded))
    out = jax.block_until_ready(fwd(x))

    assert out.shape == (2, 2), out.shape
    assert bool(jnp.all(jnp.isfinite(out)))
    print("KERNEL_OK")
</pallas_src>

<mosaic_0001>
module attributes {stable_mosaic.version = 11 : i64} {
  func.func @_conv_mm_kernel(%arg0: i32, %arg1: memref<784x256xbf16, #tpu.memory_space<vmem>>, %arg2: memref<256x128xbf16, #tpu.memory_space<vmem>>, %arg3: memref<1x128xf32, #tpu.memory_space<vmem>>, %arg4: memref<784x128xf32, #tpu.memory_space<vmem>>) attributes {dimension_semantics = [#tpu.dimension_semantics<parallel>], iteration_bounds = array<i64: 4>, scalar_prefetch = 0 : i64, scratch_operands = 0 : i64, tpu.core_type = #tpu.core_type<tc>, window_params = [{transform_indices = @transform_0, window_bounds = array<i64: 784, 256>}, {pipeline_mode = #tpu.pipeline_mode<synchronous>, transform_indices = @transform_1, window_bounds = array<i64: 256, 128>}, {pipeline_mode = #tpu.pipeline_mode<synchronous>, transform_indices = @transform_2, window_bounds = array<i64: 1, 128>}, {transform_indices = @transform_3, window_bounds = array<i64: 784, 128>}]} {
    %c0 = arith.constant 0 : index
    %c0_0 = arith.constant 0 : index
    %0 = vector.load %arg1[%c0, %c0_0] : memref<784x256xbf16, #tpu.memory_space<vmem>>, vector<784x256xbf16>
    %c0_1 = arith.constant 0 : index
    %c0_2 = arith.constant 0 : index
    %1 = vector.load %arg2[%c0_1, %c0_2] : memref<256x128xbf16, #tpu.memory_space<vmem>>, vector<256x128xbf16>
    %cst = arith.constant dense<0.000000e+00> : vector<784x128xf32>
    %2 = tpu.matmul %0, %1, %cst {dimension_numbers = #tpu.dot_dimension_numbers<[1], [0], [0], [1], [0, 0, 1, 1], [], []>} : vector<784x256xbf16>, vector<256x128xbf16>, vector<784x128xf32> -> vector<784x128xf32>
    %c0_3 = arith.constant 0 : index
    %c0_4 = arith.constant 0 : index
    %3 = vector.load %arg3[%c0_3, %c0_4] : memref<1x128xf32, #tpu.memory_space<vmem>>, vector<1x128xf32>
    %4 = vector.broadcast %3 : vector<1x128xf32> to vector<784x128xf32>
    %5 = arith.addf %2, %4 : vector<784x128xf32>
    %cst_5 = arith.constant 0.000000e+00 : f32
    %6 = vector.broadcast %cst_5 : f32 to vector<784x128xf32>
    %7 = arith.maximumf %5, %6 : vector<784x128xf32>
    %c0_6 = arith.constant 0 : index
    %c0_7 = arith.constant 0 : index
    %8 = vector.load %arg4[%c0_6, %c0_7] : memref<784x128xf32, #tpu.memory_space<vmem>>, vector<784x128xf32>
    tpu.vector_store %arg4[%c0_6, %c0_7], %7 {strides = array<i32>} : memref<784x128xf32, #tpu.memory_space<vmem>>, vector<784x128xf32>,
    return
  }
  func.func @transform_0(%arg0: i32) -> (i32, i32) {
    %c0_i32 = arith.constant 0 : i32
    %c0_i32_0 = arith.constant 0 : i32
    return %arg0, %c0_i32 : i32, i32
  }
  func.func @transform_1(%arg0: i32) -> (i32, i32) {
    %c0_i32 = arith.constant 0 : i32
    %c0_i32_0 = arith.constant 0 : i32
    %c0_i32_1 = arith.constant 0 : i32
    return %c0_i32, %c0_i32_0 : i32, i32
  }
  func.func @transform_2(%arg0: i32) -> (i32, i32) {
    %c0_i32 = arith.constant 0 : i32
    %c0_i32_0 = arith.constant 0 : i32
    %c0_i32_1 = arith.constant 0 : i32
    return %c0_i32, %c0_i32_0 : i32, i32
  }
  func.func @transform_3(%arg0: i32) -> (i32, i32) {
    %c0_i32 = arith.constant 0 : i32
    %c0_i32_0 = arith.constant 0 : i32
    return %arg0, %c0_i32 : i32, i32
  }
}

module attributes {stable_mosaic.version = 11 : i64} {
  func.func @_conv_mm_kernel(%arg0: i32, %arg1: memref<192x576xbf16, #tpu.memory_space<vmem>>, %arg2: memref<576x128xbf16, #tpu.memory_space<vmem>>, %arg3: memref<1x128xf32, #tpu.memory_space<vmem>>, %arg4: memref<192x128xf32, #tpu.memory_space<vmem>>) attributes {dimension_semantics = [#tpu.dimension_semantics<parallel>], iteration_bounds = array<i64: 2>, scalar_prefetch = 0 : i64, scratch_operands = 0 : i64, tpu.core_type = #tpu.core_type<tc>, window_params = [{transform_indices = @transform_0, window_bounds = array<i64: 192, 576>}, {pipeline_mode = #tpu.pipeline_mode<synchronous>, transform_indices = @transform_1, window_bounds = array<i64: 576, 128>}, {pipeline_mode = #tpu.pipeline_mode<synchronous>, transform_indices = @transform_2, window_bounds = array<i64: 1, 128>}, {transform_indices = @transform_3, window_bounds = array<i64: 192, 128>}]} {
    %c0 = arith.constant 0 : index
    %c0_0 = arith.constant 0 : index
    %0 = vector.load %arg1[%c0, %c0_0] : memref<192x576xbf16, #tpu.memory_space<vmem>>, vector<192x576xbf16>
    %c0_1 = arith.constant 0 : index
    %c0_2 = arith.constant 0 : index
    %1 = vector.load %arg2[%c0_1, %c0_2] : memref<576x128xbf16, #tpu.memory_space<vmem>>, vector<576x128xbf16>
    %cst = arith.constant dense<0.000000e+00> : vector<192x128xf32>
    %2 = tpu.matmul %0, %1, %cst {dimension_numbers = #tpu.dot_dimension_numbers<[1], [0], [0], [1], [0, 0, 1, 1], [], []>} : vector<192x576xbf16>, vector<576x128xbf16>, vector<192x128xf32> -> vector<192x128xf32>
    %c0_3 = arith.constant 0 : index
    %c0_4 = arith.constant 0 : index
    %3 = vector.load %arg3[%c0_3, %c0_4] : memref<1x128xf32, #tpu.memory_space<vmem>>, vector<1x128xf32>
    %4 = vector.broadcast %3 : vector<1x128xf32> to vector<192x128xf32>
    %5 = arith.addf %2, %4 : vector<192x128xf32>
    %cst_5 = arith.constant 0.000000e+00 : f32
    %6 = vector.broadcast %cst_5 : f32 to vector<192x128xf32>
    %7 = arith.maximumf %5, %6 : vector<192x128xf32>
    %c0_6 = arith.constant 0 : index
    %c0_7 = arith.constant 0 : index
    %8 = vector.load %arg4[%c0_6, %c0_7] : memref<192x128xf32, #tpu.memory_space<vmem>>, vector<192x128xf32>
    tpu.vector_store %arg4[%c0_6, %c0_7], %7 {strides = array<i32>} : memref<192x128xf32, #tpu.memory_space<vmem>>, vector<192x128xf32>,
    return
  }
  func.func @transform_0(%arg0: i32) -> (i32, i32) {
    %c0_i32 = arith.constant 0 : i32
    %c0_i32_0 = arith.constant 0 : i32
    return %arg0, %c0_i32 : i32, i32
  }
  func.func @transform_1(%arg0: i32) -> (i32, i32) {
    %c0_i32 = arith.constant 0 : i32
    %c0_i32_0 = arith.constant 0 : i32
    %c0_i32_1 = arith.constant 0 : i32
    return %c0_i32, %c0_i32_0 : i32, i32
  }
  func.func @transform_2(%arg0: i32) -> (i32, i32) {
    %c0_i32 = arith.constant 0 : i32
    %c0_i32_0 = arith.constant 0 : i32
    %c0_i32_1 = arith.constant 0 : i32
    return %c0_i32, %c0_i32_0 : i32, i32
  }
  func.func @transform_3(%arg0: i32) -> (i32, i32) {
    %c0_i32 = arith.constant 0 : i32
    %c0_i32_0 = arith.constant 0 : i32
    return %arg0, %c0_i32 : i32, i32
  }
}

module attributes {stable_mosaic.version = 11 : i64} {
  func.func @_conv_mm_kernel(%arg0: i32, %arg1: memref<48x576xbf16, #tpu.memory_space<vmem>>, %arg2: memref<576x128xbf16, #tpu.memory_space<vmem>>, %arg3: memref<1x128xf32, #tpu.memory_space<vmem>>, %arg4: memref<48x128xf32, #tpu.memory_space<vmem>>) attributes {dimension_semantics = [#tpu.dimension_semantics<parallel>], iteration_bounds = array<i64: 1>, scalar_prefetch = 0 : i64, scratch_operands = 0 : i64, tpu.core_type = #tpu.core_type<tc>, window_params = [{transform_indices = @transform_0, window_bounds = array<i64: 48, 576>}, {pipeline_mode = #tpu.pipeline_mode<synchronous>, transform_indices = @transform_1, window_bounds = array<i64: 576, 128>}, {pipeline_mode = #tpu.pipeline_mode<synchronous>, transform_indices = @transform_2, window_bounds = array<i64: 1, 128>}, {transform_indices = @transform_3, window_bounds = array<i64: 48, 128>}]} {
    %c0 = arith.constant 0 : index
    %c0_0 = arith.constant 0 : index
    %0 = vector.load %arg1[%c0, %c0_0] : memref<48x576xbf16, #tpu.memory_space<vmem>>, vector<48x576xbf16>
    %c0_1 = arith.constant 0 : index
    %c0_2 = arith.constant 0 : index
    %1 = vector.load %arg2[%c0_1, %c0_2] : memref<576x128xbf16, #tpu.memory_space<vmem>>, vector<576x128xbf16>
    %cst = arith.constant dense<0.000000e+00> : vector<48x128xf32>
    %2 = tpu.matmul %0, %1, %cst {dimension_numbers = #tpu.dot_dimension_numbers<[1], [0], [0], [1], [0, 0, 1, 1], [], []>} : vector<48x576xbf16>, vector<576x128xbf16>, vector<48x128xf32> -> vector<48x128xf32>
    %c0_3 = arith.constant 0 : index
    %c0_4 = arith.constant 0 : index
    %3 = vector.load %arg3[%c0_3, %c0_4] : memref<1x128xf32, #tpu.memory_space<vmem>>, vector<1x128xf32>
    %4 = vector.broadcast %3 : vector<1x128xf32> to vector<48x128xf32>
    %5 = arith.addf %2, %4 : vector<48x128xf32>
    %cst_5 = arith.constant 0.000000e+00 : f32
    %6 = vector.broadcast %cst_5 : f32 to vector<48x128xf32>
    %7 = arith.maximumf %5, %6 : vector<48x128xf32>
    %c0_6 = arith.constant 0 : index
    %c0_7 = arith.constant 0 : index
    %8 = vector.load %arg4[%c0_6, %c0_7] : memref<48x128xf32, #tpu.memory_space<vmem>>, vector<48x128xf32>
    tpu.vector_store %arg4[%c0_6, %c0_7], %7 {strides = array<i32>} : memref<48x128xf32, #tpu.memory_space<vmem>>, vector<48x128xf32>,
    return
  }
  func.func @transform_0(%arg0: i32) -> (i32, i32) {
    %c0_i32 = arith.constant 0 : i32
    %c0_i32_0 = arith.constant 0 : i32
    return %arg0, %c0_i32 : i32, i32
  }
  func.func @transform_1(%arg0: i32) -> (i32, i32) {
    %c0_i32 = arith.constant 0 : i32
    %c0_i32_0 = arith.constant 0 : i32
    %c0_i32_1 = arith.constant 0 : i32
    return %c0_i32, %c0_i32_0 : i32, i32
  }
  func.func @transform_2(%arg0: i32) -> (i32, i32) {
    %c0_i32 = arith.constant 0 : i32
    %c0_i32_0 = arith.constant 0 : i32
    %c0_i32_1 = arith.constant 0 : i32
    return %c0_i32, %c0_i32_0 : i32, i32
  }
  func.func @transform_3(%arg0: i32) -> (i32, i32) {
    %c0_i32 = arith.constant 0 : i32
    %c0_i32_0 = arith.constant 0 : i32
    return %arg0, %c0_i32 : i32, i32
  }
}

</mosaic_0001>

<bundles_post_ra>
// kernel: simplenet_forward.3
= control target key start
LH: loop header
LB: loop body
LE: loop exit
PB: predicated region body
PF: predicated region fallthrough
CT: control target
= control target key end

     0   :  { %s1937_s12 = smov 0   ;;  %s2344_s0 = inlined_call_operand.vmem [shape: bf16[3136,256], index: 0, kind: input, shape index: {}]   ;;  %s2345_s1 = inlined_call_operand.vmem [shape: bf16[256,128], index: 1, kind: input, shape index: {}]   ;;  %s2346_s2 = inlined_call_operand.vmem [shape: f32[1,128], index: 2, kind: input, shape index: {}]   ;;  %s2347_s3 = inlined_call_operand.vmem [shape: f32[3136,128], index: 3, kind: output, shape index: {}]  }
   0x1 LB: > { %s1578_s13 = sadd.s32 4294967295, %s1914_s12   ;;  %p1582_p0 = scmp.ge.s32.totalorder %s1914_s12, 1  ;;  %s1914_s12 = sphi %s1937_s12, %s13_s12  }
   0x2   : > { %p139_p1 = scmp.lt.s32.totalorder %s1914_s12, 5 }
   0x4   : > { %p140_p2 = pnand %p1582_p0, %p139_p1 }
   0x5   : > { %s164_s16 = smul.u32 (!%p140_p2), 98, %s1578_s13 }
   0x6   : > { %143 = sbr.rel (%p140_p2) target bundleno = 470 (0x1d6), region = 32 }
   0x7   : > { %p165_p3 = scmp.lt.s32.totalorder (!%p140_p2), %s164_s16, 391 }
   0xb   : > { %v1745_v0 = vld [vmem:[%s2345_s1 + $0x38] sm:$0xff]   ;;  %v1916_v1 = vmov 0   ;;  %v1746_v2 = vld [vmem:[%s2345_s1 + $0x30] sm:$0xff]   ;;  %v1747_v3 = vld [vmem:[%s2345_s1 + $0x28] sm:$0xff]   ;;  %s2349_s16 = smov (!%p165_p3, %s164_s16), 391 }
   0xc   : > { %901 = vmatprep.subr.bf16.mxu0 %v1916_v1  ;;  %1704 = vmatprep.subr.bf16.mxu1 %v1916_v1  ;;  %v1748_v4 = vld [vmem:[%s2345_s1 + $0x20] sm:$0xff]   ;;  %s1703_s23 = sshll.u32 %s2349_s16, 3  ;;  %v1749_v5 = vld [vmem:[%s2345_s1 + $0x18] sm:$0xff]   ;;  %v1750_v7 = vld [vmem:[%s2345_s1 + $0x10] sm:$0xff]  }
   0xd   : > { %902 = vmatpush1.bf16.msra.mxu0 %v1745_v0  ;;  %1720 = vmatpush1.bf16.msra.mxu1 %v1745_v0  ;;  %s1976_s28 = scalar_lea.vmem %s2344_s0, %s1703_s23  ;;  %v1751_v9 = vld [vmem:[%s2345_s1 + $0x8] sm:$0xff]   ;;  %v1752_v10 = vld [vmem:[%s2345_s1] sm:$0xff]   ;;  %v1753_v11 = vld [vmem:[%s2345_s1 + $0x78] sm:$0xff]   ;;  %s2145_s5 = scalar_lea.vmem %s2347_s3, %s1703_s23 }
   0xe   : > { %903 = vmatprep.subr.bf16.mxu0 %v1916_v1  ;;  %1705 = vmatprep.subr.bf16.mxu1 %v1916_v1  ;;  %v1763_v6 = vld [vmem:[%s1976_s28 + $0x4] ss:$8 sps:$4 sm:$0xff]   ;;  %v1766_v8 = vld [vmem:[%s1976_s28 + $0x194] ss:$8 sps:$4 sm:$0xff]   ;;  %v1761_v19 = vld [vmem:[%s1976_s28] ss:$8 sps:$4 sm:$0xff]  }
   0xf   : > { %933 = vmatprep.mubr.bf16.mxu0 %v1763_v6  ;;  %1133 = vmatprep.mubr.bf16.mxu1 %v1766_v8  ;;  %v1754_v12 = vld [vmem:[%s2345_s1 + $0x70] sm:$0xff]   ;;  %v1755_v13 = vld [vmem:[%s2345_s1 + $0x68] sm:$0xff]   ;;  %v1756_v14 = vld [vmem:[%s2345_s1 + $0x60] sm:$0xff]  }
  0x10   : > { %v1757_v15 = vld [vmem:[%s2345_s1 + $0x58] sm:$0xff]   ;;  %v1758_v16 = vld [vmem:[%s2345_s1 + $0x50] sm:$0xff]   ;;  %v1759_v17 = vld [vmem:[%s2345_s1 + $0x48] sm:$0xff]  }
  0x11   : > { %904 = vmatpush1.bf16.msra.mxu0 %v1746_v2  ;;  %1721 = vmatpush1.bf16.msra.mxu1 %v1746_v2  ;;  %v1760_v18 = vld [vmem:[%s2345_s1 + $0x40] sm:$0xff]   ;;  %v1764_v20 = vld [vmem:[%s1976_s28 + $0x190] ss:$8 sps:$4 sm:$0xff]   ;;  %v1767_v21 = vld [vmem:[%s1976_s28 + $0x14] ss:$8 sps:$4 sm:$0xff]  }
  0x12   : > { %905 = vmatprep.subr.bf16.mxu0 %v1916_v1  ;;  %1706 = vmatprep.subr.bf16.mxu1 %v1916_v1  ;;  %v1770_v22 = vld [vmem:[%s1976_s28 + $0x1a4] ss:$8 sps:$4 sm:$0xff]   ;;  %v1769_v23 = vld [vmem:[%s1976_s28 + $0x10] ss:$8 sps:$4 sm:$0xff]   ;;  %v1772_v24 = vld [vmem:[%s1976_s28 + $0x1a0] ss:$8 sps:$4 sm:$0xff]  }
  0x13   : > { %v1773_v25 = vld [vmem:[%s1976_s28 + $0x24] ss:$8 sps:$4 sm:$0xff]   ;;  %v1776_v26 = vld [vmem:[%s1976_s28 + $0x1b4] ss:$8 sps:$4 sm:$0xff]   ;;  %v1775_v27 = vld [vmem:[%s1976_s28 + $0x20] ss:$8 sps:$4 sm:$0xff]  }
  0x14   : > { %v1778_v28 = vld [vmem:[%s1976_s28 + $0x1b0] ss:$8 sps:$4 sm:$0xff]   ;;  %v1779_v29 = vld [vmem:[%s1976_s28 + $0x34] ss:$8 sps:$4 sm:$0xff]   ;;  %v1782_v30 = vld [vmem:[%s1976_s28 + $0x1c4] ss:$8 sps:$4 sm:$0xff]  }
  0x15   : > { %906 = vmatpush1.bf16.msra.mxu0 %v1747_v3  ;;  %1722 = vmatpush1.bf16.msra.mxu1 %v1747_v3  ;;  %v1781_v31 = vld [vmem:[%s1976_s28 + $0x30] ss:$8 sps:$4 sm:$0xff]   ;;  %v1784_v32 = vld [vmem:[%s1976_s28 + $0x1c0] ss:$8 sps:$4 sm:$0xff]   ;;  %v1785_v33 = vld [vmem:[%s1976_s28 + $0x44] ss:$8 sps:$4 sm:$0xff]  }
  0x16   : > { %907 = vmatprep.subr.bf16.mxu0 %v1916_v1  ;;  %1707 = vmatprep.subr.bf16.mxu1 %v1916_v1  ;;  %v1788_v34 = vld [vmem:[%s1976_s28 + $0x1d4] ss:$8 sps:$4 sm:$0xff]   ;;  %v1787_v35 = vld [vmem:[%s1976_s28 + $0x40] ss:$8 sps:$4 sm:$0xff]   ;;  %v1790_v36 = vld [vmem:[%s1976_s28 + $0x1d0] ss:$8 sps:$4 sm:$0xff]  }
  0x17   : > { %v1791_v37 = vld [vmem:[%s1976_s28 + $0x54] ss:$8 sps:$4 sm:$0xff]   ;;  %v1794_v38 = vld [vmem:[%s1976_s28 + $0x1e4] ss:$8 sps:$4 sm:$0xff]   ;;  %v1793_v39 = vld [vmem:[%s1976_s28 + $0x50] ss:$8 sps:$4 sm:$0xff]  }
  0x18   : > { %v1796_v40 = vld [vmem:[%s1976_s28 + $0x1e0] ss:$8 sps:$4 sm:$0xff]   ;;  %v1797_v41 = vld [vmem:[%s1976_s28 + $0x64] ss:$8 sps:$4 sm:$0xff]   ;;  %v1800_v42 = vld [vmem:[%s1976_s28 + $0x1f4] ss:$8 sps:$4 sm:$0xff]  }
  0x19   : > { %908 = vmatpush1.bf16.msra.mxu0 %v1748_v4  ;;  %1723 = vmatpush1.bf16.msra.mxu1 %v1748_v4  ;;  %v1799_v43 = vld [vmem:[%s1976_s28 + $0x60] ss:$8 sps:$4 sm:$0xff]   ;;  %v1802_v44 = vld [vmem:[%s1976_s28 + $0x1f0] ss:$8 sps:$4 sm:$0xff]   ;;  %v1803_v45 = vld [vmem:[%s1976_s28 + $0x74] ss:$8 sps:$4 sm:$0xff]  }
  0x1a   : > { %909 = vmatprep.subr.bf16.mxu0 %v1916_v1  ;;  %1708 = vmatprep.subr.bf16.mxu1 %v1916_v1  ;;  %v1806_v46 = vld [vmem:[%s1976_s28 + $0x204] ss:$8 sps:$4 sm:$0xff]   ;;  %v1805_v47 = vld [vmem:[%s1976_s28 + $0x70] ss:$8 sps:$4 sm:$0xff]   ;;  %v1808_v48 = vld [vmem:[%s1976_s28 + $0x200] ss:$8 sps:$4 sm:$0xff]  }
  0x1b   : > { %v1809_v49 = vld [vmem:[%s1976_s28 + $0x84] ss:$8 sps:$4 sm:$0xff]   ;;  %v1812_v50 = vld [vmem:[%s1976_s28 + $0x214] ss:$8 sps:$4 sm:$0xff]   ;;  %v1811_v51 = vld [vmem:[%s1976_s28 + $0x80] ss:$8 sps:$4 sm:$0xff]  }
  0x1c   : > { %v1814_v52 = vld [vmem:[%s1976_s28 + $0x210] ss:$8 sps:$4 sm:$0xff]   ;;  %v1815_v53 = vld [vmem:[%s1976_s28 + $0x94] ss:$8 sps:$4 sm:$0xff]   ;;  %v1818_v54 = vld [vmem:[%s1976_s28 + $0x224] ss:$8 sps:$4 sm:$0xff]  }
  0x1d   : > { %910 = vmatpush1.bf16.msra.mxu0 %v1749_v5  ;;  %1724 = vmatpush1.bf16.msra.mxu1 %v1749_v5  ;;  %v1817_v55 = vld [vmem:[%s1976_s28 + $0x90] ss:$8 sps:$4 sm:$0xff]   ;;  %v1820_v56 = vld [vmem:[%s1976_s28 + $0x220] ss:$8 sps:$4 sm:$0xff]   ;;  %v1821_v57 = vld [vmem:[%s1976_s28 + $0xa4] ss:$8 sps:$4 sm:$0xff]  }
  0x1e   : > { %911 = vmatprep.subr.bf16.mxu0 %v1916_v1  ;;  %1709 = vmatprep.subr.bf16.mxu1 %v1916_v1  ;;  %v1824_v58 = vld [vmem:[%s1976_s28 + $0x234] ss:$8 sps:$4 sm:$0xff]   ;;  %v1823_v59 = vld [vmem:[%s1976_s28 + $0xa0] ss:$8 sps:$4 sm:$0xff]   ;;  %v1826_v60 = vld [vmem:[%s1976_s28 + $0x230] ss:$8 sps:$4 sm:$0xff]  }
  0x1f   : > { %v1827_v61 = vld [vmem:[%s1976_s28 + $0xb4] ss:$8 sps:$4 sm:$0xff]   ;;  %v1830_v62 = vld [vmem:[%s1976_s28 + $0x244] ss:$8 sps:$4 sm:$0xff]   ;;  %v1829_v63 = vld [vmem:[%s1976_s28 + $0xb0] ss:$8 sps:$4 sm:$0xff]  }
  0x20   : > { %v1832_v0 = vld [vmem:[%s1976_s28 + $0x240] ss:$8 sps:$4 sm:$0xff]   ;;  %v1836_v2 = vld [vmem:[%s1976_s28 + $0x254] ss:$8 sps:$4 sm:$0xff]   ;;  %v1838_v4 = vld [vmem:[%s1976_s28 + $0x250] ss:$8 sps:$4 sm:$0xff]  }
  0x21   : > { %912 = vmatpush1.bf16.msra.mxu0 %v1750_v7  ;;  %1725 = vmatpush1.bf16.msra.mxu1 %v1750_v7  ;;  %v1835_v3 = vld [vmem:[%s1976_s28 + $0xc0] ss:$8 sps:$4 sm:$0xff]   ;;  %v1839_v5 = vld [vmem:[%s1976_s28 + $0xd4] ss:$8 sps:$4 sm:$0xff]   ;;  %v1842_v6 = vld [vmem:[%s1976_s28 + $0x264] ss:$8 sps:$4 sm:$0xff]  }
  0x22   : > { %913 = vmatprep.subr.bf16.mxu0 %v1916_v1  ;;  %1710 = vmatprep.subr.bf16.mxu1 %v1916_v1  ;;  %v1841_v7 = vld [vmem:[%s1976_s28 + $0xd0] ss:$8 sps:$4 sm:$0xff]   ;;  %v1844_v8 = vld [vmem:[%s1976_s28 + $0x260] ss:$8 sps:$4 sm:$0xff]  }
  0x25   : > { %914 = vmatpush1.bf16.msra.mxu0 %v1751_v9  ;;  %1726 = vmatpush1.bf16.msra.mxu1 %v1751_v9  ;;  %v1845_v9 = vld [vmem:[%s1976_s28 + $0xe4] ss:$8 sps:$4 sm:$0xff]  }
  0x26   : > { %915 = vmatprep.subr.bf16.mxu0 %v1916_v1  ;;  %1711 = vmatprep.subr.bf16.mxu1 %v1916_v1 }
  0x29   : > { %916 = vmatpush1.bf16.msra.mxu0 %v1752_v10  ;;  %1727 = vmatpush1.bf16.msra.mxu1 %v1752_v10  ;;  %v1848_v10 = vld [vmem:[%s1976_s28 + $0x274] ss:$8 sps:$4 sm:$0xff]  }
  0x2a   : > { %917 = vmatprep.subr.bf16.mxu0 %v1916_v1  ;;  %1712 = vmatprep.subr.bf16.mxu1 %v1916_v1 }
  0x2d   : > { %918 = vmatpush2.bf16.msra.mxu0 %v1753_v11  ;;  %1728 = vmatpush2.bf16.msra.mxu1 %v1753_v11  ;;  %v1847_v11 = vld [vmem:[%s1976_s28 + $0xe0] ss:$8 sps:$4 sm:$0xff]  }
  0x2e   : > { %919 = vmatprep.subr.bf16.mxu0 %v1916_v1  ;;  %1713 = vmatprep.subr.bf16.mxu1 %v1916_v1 }
  0x31   : > { %920 = vmatpush2.bf16.msra.mxu0 %v1754_v12  ;;  %1729 = vmatpush2.bf16.msra.mxu1 %v1754_v12  ;;  %v1850_v12 = vld [vmem:[%s1976_s28 + $0x270] ss:$8 sps:$4 sm:$0xff]  }
  0x32   : > { %921 = vmatprep.subr.bf16.mxu0 %v1916_v1  ;;  %1714 = vmatprep.subr.bf16.mxu1 %v1916_v1 }
  0x35   : > { %922 = vmatpush2.bf16.msra.mxu0 %v1755_v13  ;;  %1730 = vmatpush2.bf16.msra.mxu1 %v1755_v13  ;;  %v1851_v13 = vld [vmem:[%s1976_s28 + $0xf4] ss:$8 sps:$4 sm:$0xff]  }
  0x36   : > { %923 = vmatprep.subr.bf16.mxu0 %v1916_v1  ;;  %1715 = vmatprep.subr.bf16.mxu1 %v1916_v1 }
  0x39   : > { %924 = vmatpush2.bf16.msra.mxu0 %v1756_v14  ;;  %1731 = vmatpush2.bf16.msra.mxu1 %v1756_v14  ;;  %v1854_v14 = vld [vmem:[%s1976_s28 + $0x284] ss:$8 sps:$4 sm:$0xff]  }
  0x3a   : > { %925 = vmatprep.subr.bf16.mxu0 %v1916_v1  ;;  %1716 = vmatprep.subr.bf16.mxu1 %v1916_v1 }
  0x3d   : > { %926 = vmatpush2.bf16.msra.mxu0 %v1757_v15  ;;  %1732 = vmatpush2.bf16.msra.mxu1 %v1757_v15  ;;  %v1853_v15 = vld [vmem:[%s1976_s28 + $0xf0] ss:$8 sps:$4 sm:$0xff]  }
  0x3e   : > { %927 = vmatprep.subr.bf16.mxu0 %v1916_v1  ;;  %1717 = vmatprep.subr.bf16.mxu1 %v1916_v1 }
  0x41   : > { %928 = vmatpush2.bf16.msra.mxu0 %v1758_v16  ;;  %1733 = vmatpush2.bf16.msra.mxu1 %v1758_v16  ;;  %v1856_v16 = vld [vmem:[%s1976_s28 + $0x280] ss:$8 sps:$4 sm:$0xff]  }
  0x42   : > { %929 = vmatprep.subr.bf16.mxu0 %v1916_v1  ;;  %1718 = vmatprep.subr.bf16.mxu1 %v1916_v1 }
  0x45   : > { %930 = vmatpush2.bf16.msra.mxu0 %v1759_v17  ;;  %1734 = vmatpush2.bf16.msra.mxu1 %v1759_v17  ;;  %v1857_v17 = vld [vmem:[%s1976_s28 + $0x104] ss:$8 sps:$4 sm:$0xff]  }
  0x46   : > { %931 = vmatprep.subr.bf16.mxu0 %v1916_v1  ;;  %1719 = vmatprep.subr.bf16.mxu1 %v1916_v1  ;;  %v1833_v1 = vld [vmem:[%s1976_s28 + $0xc4] ss:$8 sps:$4 sm:$0xff]  }
  0x49   : > { %932 = vmatpush2.bf16.msra.mxu0 %v1760_v18  ;;  %1735 = vmatpush2.bf16.msra.mxu1 %v1760_v18  ;;  %v1860_v18 = vld [vmem:[%s1976_s28 + $0x294] ss:$8 sps:$4 sm:$0xff]  }
  0x4c   : > { %934 = vmatmul.mubr.bf16.vlgmr.msra.gmra.mxu0 %v1761_v19  ;;  %1134 = vmatmul.mubr.bf16.vlgmr.msra.gmra.mxu1 %v1764_v20  ;;  %v1859_v19 = vld [vmem:[%s1976_s28 + $0x100] ss:$8 sps:$4 sm:$0xff]   ;;  %v1862_v20 = vld [vmem:[%s1976_s28 + $0x290] ss:$8 sps:$4 sm:$0xff]  }
  0x4d   : > { %941 = vmatprep.mubr.bf16.mxu0 %v1767_v21  ;;  %1141 = vmatprep.mubr.bf16.mxu1 %v1770_v22  ;;  %v1863_v21 = vld [vmem:[%s1976_s28 + $0x114] ss:$8 sps:$4 sm:$0xff]   ;;  %v1866_v22 = vld [vmem:[%s1976_s28 + $0x2a4] ss:$8 sps:$4 sm:$0xff]  }
  0x54   : > { %942 = vmatmul.mubr.bf16.gmra.mxu0 %v1769_v23  ;;  %1142 = vmatmul.mubr.bf16.gmra.mxu1 %v1772_v24  ;;  %v1865_v23 = vld [vmem:[%s1976_s28 + $0x110] ss:$8 sps:$4 sm:$0xff]   ;;  %v1868_v24 = vld [vmem:[%s1976_s28 + $0x2a0] ss:$8 sps:$4 sm:$0xff]  }
  0x55   : > { %949 = vmatprep.mubr.bf16.mxu0 %v1773_v25  ;;  %1149 = vmatprep.mubr.bf16.mxu1 %v1776_v26  ;;  %v1869_v25 = vld [vmem:[%s1976_s28 + $0x124] ss:$8 sps:$4 sm:$0xff]   ;;  %v1872_v26 = vld [vmem:[%s1976_s28 + $0x2b4] ss:$8 sps:$4 sm:$0xff]  }
  0x5c   : > { %950 = vmatmul.mubr.bf16.gmra.mxu0 %v1775_v27  ;;  %1150 = vmatmul.mubr.bf16.gmra.mxu1 %v1778_v28  ;;  %v1871_v27 = vld [vmem:[%s1976_s28 + $0x120] ss:$8 sps:$4 sm:$0xff]   ;;  %v1874_v28 = vld [vmem:[%s1976_s28 + $0x2b0] ss:$8 sps:$4 sm:$0xff]  }
  0x5d   : > { %957 = vmatprep.mubr.bf16.mxu0 %v1779_v29  ;;  %1157 = vmatprep.mubr.bf16.mxu1 %v1782_v30  ;;  %v1875_v29 = vld [vmem:[%s1976_s28 + $0x134] ss:$8 sps:$4 sm:$0xff]   ;;  %v1878_v30 = vld [vmem:[%s1976_s28 + $0x2c4] ss:$8 sps:$4 sm:$0xff]  }
  0x64   : > { %958 = vmatmul.mubr.bf16.gmra.mxu0 %v1781_v31  ;;  %1158 = vmatmul.mubr.bf16.gmra.mxu1 %v1784_v32  ;;  %v1877_v31 = vld [vmem:[%s1976_s28 + $0x130] ss:$8 sps:$4 sm:$0xff]   ;;  %v1880_v32 = vld [vmem:[%s1976_s28 + $0x2c0] ss:$8 sps:$4 sm:$0xff]  }
  0x65   : > { %965 = vmatprep.mubr.bf16.mxu0 %v1785_v33  ;;  %1165 = vmatprep.mubr.bf16.mxu1 %v1788_v34  ;;  %v1881_v33 = vld [vmem:[%s1976_s28 + $0x144] ss:$8 sps:$4 sm:$0xff]   ;;  %v1884_v34 = vld [vmem:[%s1976_s28 + $0x2d4] ss:$8 sps:$4 sm:$0xff]  }
  0x6c   : > { %966 = vmatmul.mubr.bf16.gmra.mxu0 %v1787_v35  ;;  %1166 = vmatmul.mubr.bf16.gmra.mxu1 %v1790_v36  ;;  %v1883_v35 = vld [vmem:[%s1976_s28 + $0x140] ss:$8 sps:$4 sm:$0xff]   ;;  %v1886_v36 = vld [vmem:[%s1976_s28 + $0x2d0] ss:$8 sps:$4 sm:$0xff]  }
  0x6d   : > { %973 = vmatprep.mubr.bf16.mxu0 %v1791_v37  ;;  %1173 = vmatprep.mubr.bf16.mxu1 %v1794_v38  ;;  %v1887_v37 = vld [vmem:[%s1976_s28 + $0x154] ss:$8 sps:$4 sm:$0xff]   ;;  %v1890_v38 = vld [vmem:[%s1976_s28 + $0x2e4] ss:$8 sps:$4 sm:$0xff]  }
  0x74   : > { %974 = vmatmul.mubr.bf16.gmra.mxu0 %v1793_v39  ;;  %1174 = vmatmul.mubr.bf16.gmra.mxu1 %v1796_v40  ;;  %v1889_v39 = vld [vmem:[%s1976_s28 + $0x150] ss:$8 sps:$4 sm:$0xff]   ;;  %v1892_v40 = vld [vmem:[%s1976_s28 + $0x2e0] ss:$8 sps:$4 sm:$0xff]  }
  0x75   : > { %981 = vmatprep.mubr.bf16.mxu0 %v1797_v41  ;;  %1181 = vmatprep.mubr.bf16.mxu1 %v1800_v42  ;;  %v1893_v41 = vld [vmem:[%s1976_s28 + $0x164] ss:$8 sps:$4 sm:$0xff]   ;;  %v1896_v42 = vld [vmem:[%s1976_s28 + $0x2f4] ss:$8 sps:$4 sm:$0xff]  }
  0x7c   : > { %982 = vmatmul.mubr.bf16.gmra.mxu0 %v1799_v43  ;;  %1182 = vmatmul.mubr.bf16.gmra.mxu1 %v1802_v44  ;;  %v1895_v43 = vld [vmem:[%s1976_s28 + $0x160] ss:$8 sps:$4 sm:$0xff]   ;;  %v1898_v44 = vld [vmem:[%s1976_s28 + $0x2f0] ss:$8 sps:$4 sm:$0xff]  }
  0x7d   : > { %989 = vmatprep.mubr.bf16.mxu0 %v1803_v45  ;;  %1189 = vmatprep.mubr.bf16.mxu1 %v1806_v46  ;;  %v1899_v45 = vld [vmem:[%s1976_s28 + $0x174] ss:$8 sps:$4 sm:$0xff]   ;;  %v1902_v46 = vld [vmem:[%s1976_s28 + $0x304] ss:$8 sps:$4 sm:$0xff]  }
  0x84   : > { %990 = vmatmul.mubr.bf16.gmra.mxu0 %v1805_v47  ;;  %1190 = vmatmul.mubr.bf16.gmra.mxu1 %v1808_v48  ;;  %v1901_v47 = vld [vmem:[%s1976_s28 + $0x170] ss:$8 sps:$4 sm:$0xff]   ;;  %v1904_v48 = vld [vmem:[%s1976_s28 + $0x300] ss:$8 sps:$4 sm:$0xff]  }
  0x85   : > { %997 = vmatprep.mubr.bf16.mxu0 %v1809_v49  ;;  %1197 = vmatprep.mubr.bf16.mxu1 %v1812_v50  ;;  %v1905_v49 = vld [vmem:[%s1976_s28 + $0x184] ss:$8 sps:$4 sm:$0xff]   ;;  %v1907_v50 = vld [vmem:[%s1976_s28 + $0x180] ss:$8 sps:$4 sm:$0xff]  }
  0x8c   : > { %998 = vmatmul.mubr.bf16.gmra.mxu0 %v1811_v51  ;;  %1198 = vmatmul.mubr.bf16.gmra.mxu1 %v1814_v52  ;;  %v2136_v51 = vld [vmem:[%s2346_s2] ss:$0 sm:$0xff] }
  0x8d   : > { %1005 = vmatprep.mubr.bf16.mxu0 %v1815_v53  ;;  %1205 = vmatprep.mubr.bf16.mxu1 %v1818_v54 }
  0x94   : > { %1006 = vmatmul.mubr.bf16.gmra.mxu0 %v1817_v55  ;;  %1206 = vmatmul.mubr.bf16.gmra.mxu1 %v1820_v56 }
  0x95   : > { %1013 = vmatprep.mubr.bf16.mxu0 %v1821_v57  ;;  %1213 = vmatprep.mubr.bf16.mxu1 %v1824_v58 }
  0x9c   : > { %1014 = vmatmul.mubr.bf16.gmra.mxu0 %v1823_v59  ;;  %1214 = vmatmul.mubr.bf16.gmra.mxu1 %v1826_v60 }
  0x9d   : > { %1021 = vmatprep.mubr.bf16.mxu0 %v1827_v61  ;;  %1221 = vmatprep.mubr.bf16.mxu1 %v1830_v62 }
  0xa4   : > { %1022 = vmatmul.mubr.bf16.gmra.mxu0 %v1829_v63  ;;  %1222 = vmatmul.mubr.bf16.gmra.mxu1 %v1832_v0 }
  0xa5   : > { %1029 = vmatprep.mubr.bf16.mxu0 %v1833_v1  ;;  %1229 = vmatprep.mubr.bf16.mxu1 %v1836_v2 }
  0xac   : > { %1030 = vmatmul.mubr.bf16.gmra.mxu0 %v1835_v3  ;;  %1230 = vmatmul.mubr.bf16.gmra.mxu1 %v1838_v4 }
  0xad   : > { %1037 = vmatprep.mubr.bf16.mxu0 %v1839_v5  ;;  %1237 = vmatprep.mubr.bf16.mxu1 %v1842_v6 }
  0xb4   : > { %1038 = vmatmul.mubr.bf16.gmra.mxu0 %v1841_v7  ;;  %1238 = vmatmul.mubr.bf16.gmra.mxu1 %v1844_v8 }
  0xb5   : > { %1045 = vmatprep.mubr.bf16.mxu0 %v1845_v9  ;;  %1245 = vmatprep.mubr.bf16.mxu1 %v1848_v10 }
  0xbc   : > { %1046 = vmatmul.mubr.bf16.gmra.mxu0 %v1847_v11  ;;  %1246 = vmatmul.mubr.bf16.gmra.mxu1 %v1850_v12 }
  0xbd   : > { %1053 = vmatprep.mubr.bf16.mxu0 %v1851_v13  ;;  %1253 = vmatprep.mubr.bf16.mxu1 %v1854_v14 }
  0xc4   : > { %1054 = vmatmul.mubr.bf16.gmra.mxu0 %v1853_v15  ;;  %1254 = vmatmul.mubr.bf16.gmra.mxu1 %v1856_v16 }
  0xc5   : > { %1061 = vmatprep.mubr.bf16.mxu0 %v1857_v17  ;;  %1261 = vmatprep.mubr.bf16.mxu1 %v1860_v18 }
  0xcc   : > { %1062 = vmatmul.mubr.bf16.gmra.mxu0 %v1859_v19  ;;  %1262 = vmatmul.mubr.bf16.gmra.mxu1 %v1862_v20 }
  0xcd   : > { %1069 = vmatprep.mubr.bf16.mxu0 %v1863_v21  ;;  %1269 = vmatprep.mubr.bf16.mxu1 %v1866_v22 }
  0xd4   : > { %1070 = vmatmul.mubr.bf16.gmra.mxu0 %v1865_v23  ;;  %1270 = vmatmul.mubr.bf16.gmra.mxu1 %v1868_v24 }
  0xd5   : > { %1077 = vmatprep.mubr.bf16.mxu0 %v1869_v25  ;;  %1277 = vmatprep.mubr.bf16.mxu1 %v1872_v26 }
  0xdc   : > { %1078 = vmatmul.mubr.bf16.gmra.mxu0 %v1871_v27  ;;  %1278 = vmatmul.mubr.bf16.gmra.mxu1 %v1874_v28 }
  0xdd   : > { %1085 = vmatprep.mubr.bf16.mxu0 %v1875_v29  ;;  %1285 = vmatprep.mubr.bf16.mxu1 %v1878_v30 }
  0xe4   : > { %1086 = vmatmul.mubr.bf16.gmra.mxu0 %v1877_v31  ;;  %1286 = vmatmul.mubr.bf16.gmra.mxu1 %v1880_v32 }
  0xe5   : > { %1093 = vmatprep.mubr.bf16.mxu0 %v1881_v33  ;;  %1293 = vmatprep.mubr.bf16.mxu1 %v1884_v34 }
  0xec   : > { %1094 = vmatmul.mubr.bf16.gmra.mxu0 %v1883_v35  ;;  %1294 = vmatmul.mubr.bf16.gmra.mxu1 %v1886_v36 }
  0xed   : > { %1101 = vmatprep.mubr.bf16.mxu0 %v1887_v37  ;;  %1301 = vmatprep.mubr.bf16.mxu1 %v1890_v38 }
  0xf4   : > { %1102 = vmatmul.mubr.bf16.gmra.mxu0 %v1889_v39  ;;  %1302 = vmatmul.mubr.bf16.gmra.mxu1 %v1892_v40 }
  0xf5   : > { %1109 = vmatprep.mubr.bf16.mxu0 %v1893_v41  ;;  %1309 = vmatprep.mubr.bf16.mxu1 %v1896_v42 }
  0xfc   : > { %1110 = vmatmul.mubr.bf16.gmra.mxu0 %v1895_v43  ;;  %1310 = vmatmul.mubr.bf16.gmra.mxu1 %v1898_v44 }
  0xfd   : > { %1117 = vmatprep.mubr.bf16.mxu0 %v1899_v45  ;;  %1317 = vmatprep.mubr.bf16.mxu1 %v1902_v46 }
 0x104   : > { %1118 = vmatmul.mubr.bf16.gmra.mxu0 %v1901_v47  ;;  %1318 = vmatmul.mubr.bf16.gmra.mxu1 %v1904_v48 }
 0x105   : > { %1125 = vmatprep.mubr.bf16.mxu0 %v1905_v49 }
 0x10c   : > { %v935_v52 = vpop.f32.mrf.mxu0  ;;  %1126 = vmatmul.mubr.bf16.gmra.mxu0 %v1907_v50  ;;  %v1135_v53 = vpop.f32.mrf.mxu1 }
 0x10d   : > { %v936_v54 = vadd.f32 %v2136_v51, %v935_v52  ;;  %v1136_v55 = vadd.f32 %v2136_v51, %v1135_v53 }
 0x10e   : > { %v937_v56 = vpop.f32.mrf.mxu0  ;;  %v1137_v57 = vpop.f32.mrf.mxu1 }
 0x10f   : > { %v1326_v58 = vmax.f32 %v936_v54, 0.0  ;;  %v1376_v59 = vmax.f32 %v1136_v55, 0.0 }
 0x110   : > { %v938_v60 = vpop.f32.mrf.mxu0  ;;  %v1138_v61 = vpop.f32.mrf.mxu1 }
 0x111   : > { %1424 = vst [vmem:[%s2145_s5] sm:$0xff] %v1326_v58  ;;  %1474 = vst [vmem:[%s2145_s5 + $0x190] sm:$0xff] %v1376_v59  ;;  %v939_v62 = vadd.f32 %v2136_v51, %v938_v60  ;;  %v1139_v63 = vadd.f32 %v2136_v51, %v1138_v61 }
 0x112   : > { %v940_v0 = vpop.f32.mrf.mxu0  ;;  %v1140_v1 = vpop.f32.mrf.mxu1 }
 0x113   : > { %v1327_v2 = vmax.f32 %v939_v62, 0.0  ;;  %v1377_v3 = vmax.f32 %v1139_v63, 0.0 }
 0x114   : > { %v943_v4 = vpop.f32.mrf.mxu0  ;;  %v1143_v5 = vpop.f32.mrf.mxu1 }
 0x115   : > { %1425 = vst [vmem:[%s2145_s5 + $0x8] sm:$0xff] %v1327_v2  ;;  %1475 = vst [vmem:[%s2145_s5 + $0x198] sm:$0xff] %v1377_v3  ;;  %v944_v6 = vadd.f32 %v2136_v51, %v943_v4  ;;  %v1144_v7 = vadd.f32 %v2136_v51, %v1143_v5 }
 0x116   : > { %v945_v8 = vpop.f32.mrf.mxu0  ;;  %v1145_v9 = vpop.f32.mrf.mxu1 }
 0x117   : > { %v1328_v10 = vmax.f32 %v944_v6, 0.0  ;;  %v1378_v11 = vmax.f32 %v1144_v7, 0.0 }
 0x118   : > { %v946_v12 = vpop.f32.mrf.mxu0  ;;  %v1146_v13 = vpop.f32.mrf.mxu1 }
 0x119   : > { %1426 = vst [vmem:[%s2145_s5 + $0x10] sm:$0xff] %v1328_v10  ;;  %1476 = vst [vmem:[%s2145_s5 + $0x1a0] sm:$0xff] %v1378_v11  ;;  %v947_v14 = vadd.f32 %v2136_v51, %v946_v12  ;;  %v1147_v15 = vadd.f32 %v2136_v51, %v1146_v13 }
 0x11a   : > { %v948_v16 = vpop.f32.mrf.mxu0  ;;  %v1148_v17 = vpop.f32.mrf.mxu1 }
 0x11b   : > { %v1329_v18 = vmax.f32 %v947_v14, 0.0  ;;  %v1379_v19 = vmax.f32 %v1147_v15, 0.0 }
 0x11c   : > { %v951_v20 = vpop.f32.mrf.mxu0  ;;  %v1151_v21 = vpop.f32.mrf.mxu1 }
 0x11d   : > { %1427 = vst [vmem:[%s2145_s5 + $0x18] sm:$0xff] %v1329_v18  ;;  %1477 = vst [vmem:[%s2145_s5 + $0x1a8] sm:$0xff] %v1379_v19  ;;  %v952_v22 = vadd.f32 %v2136_v51, %v951_v20  ;;  %v1152_v23 = vadd.f32 %v2136_v51, %v1151_v21 }
 0x11e   : > { %v953_v24 = vpop.f32.mrf.mxu0  ;;  %v1153_v25 = vpop.f32.mrf.mxu1 }
 0x11f   : > { %v1330_v26 = vmax.f32 %v952_v22, 0.0  ;;  %v1380_v27 = vmax.f32 %v1152_v23, 0.0 }
 0x120   : > { %v954_v28 = vpop.f32.mrf.mxu0  ;;  %v1154_v29 = vpop.f32.mrf.mxu1 }
 0x121   : > { %1428 = vst [vmem:[%s2145_s5 + $0x20] sm:$0xff] %v1330_v26  ;;  %1478 = vst [vmem:[%s2145_s5 + $0x1b0] sm:$0xff] %v1380_v27  ;;  %v955_v30 = vadd.f32 %v2136_v51, %v954_v28  ;;  %v1155_v31 = vadd.f32 %v2136_v51, %v1154_v29 }
 0x122   : > { %v956_v32 = vpop.f32.mrf.mxu0  ;;  %v1156_v33 = vpop.f32.mrf.mxu1 }
 0x123   : > { %v1331_v34 = vmax.f32 %v955_v30, 0.0  ;;  %v1381_v35 = vmax.f32 %v1155_v31, 0.0 }
 0x124   : > { %v959_v36 = vpop.f32.mrf.mxu0  ;;  %v1159_v37 = vpop.f32.mrf.mxu1 }
 0x125   : > { %1429 = vst [vmem:[%s2145_s5 + $0x28] sm:$0xff] %v1331_v34  ;;  %1479 = vst [vmem:[%s2145_s5 + $0x1b8] sm:$0xff] %v1381_v35  ;;  %v960_v38 = vadd.f32 %v2136_v51, %v959_v36  ;;  %v1160_v39 = vadd.f32 %v2136_v51, %v1159_v37 }
 0x126   : > { %v961_v40 = vpop.f32.mrf.mxu0  ;;  %v1161_v41 = vpop.f32.mrf.mxu1 }
 0x127   : > { %v1332_v42 = vmax.f32 %v960_v38, 0.0  ;;  %v1382_v43 = vmax.f32 %v1160_v39, 0.0 }
 0x128   : > { %v962_v44 = vpop.f32.mrf.mxu0  ;;  %v1162_v45 = vpop.f32.mrf.mxu1 }
 0x129   : > { %1430 = vst [vmem:[%s2145_s5 + $0x30] sm:$0xff] %v1332_v42  ;;  %1480 = vst [vmem:[%s2145_s5 + $0x1c0] sm:$0xff] %v1382_v43  ;;  %v963_v46 = vadd.f32 %v2136_v51, %v962_v44  ;;  %v1163_v47 = vadd.f32 %v2136_v51, %v1162_v45 }
 0x12a   : > { %v964_v48 = vpop.f32.mrf.mxu0  ;;  %v1164_v49 = vpop.f32.mrf.mxu1 }
 0x12b   : > { %v1333_v50 = vmax.f32 %v963_v46, 0.0  ;;  %v1383_v52 = vmax.f32 %v1163_v47, 0.0 }
 0x12c   : > { %v967_v53 = vpop.f32.mrf.mxu0  ;;  %v1167_v54 = vpop.f32.mrf.mxu1 }
 0x12d   : > { %1431 = vst [vmem:[%s2145_s5 + $0x38] sm:$0xff] %v1333_v50  ;;  %1481 = vst [vmem:[%s2145_s5 + $0x1c8] sm:$0xff] %v1383_v52  ;;  %v968_v55 = vadd.f32 %v2136_v51, %v967_v53  ;;  %v1168_v56 = vadd.f32 %v2136_v51, %v1167_v54 }
 0x12e   : > { %v969_v57 = vpop.f32.mrf.mxu0  ;;  %v1169_v58 = vpop.f32.mrf.mxu1 }
 0x12f   : > { %v1334_v59 = vmax.f32 %v968_v55, 0.0  ;;  %v1384_v60 = vmax.f32 %v1168_v56, 0.0 }
 0x130   : > { %v970_v61 = vpop.f32.mrf.mxu0  ;;  %v1170_v62 = vpop.f32.mrf.mxu1 }
 0x131   : > { %1432 = vst [vmem:[%s2145_s5 + $0x40] sm:$0xff] %v1334_v59  ;;  %1482 = vst [vmem:[%s2145_s5 + $0x1d0] sm:$0xff] %v1384_v60  ;;  %v971_v63 = vadd.f32 %v2136_v51, %v970_v61  ;;  %v1171_v0 = vadd.f32 %v2136_v51, %v1170_v62 }
 0x132   : > { %v972_v1 = vpop.f32.mrf.mxu0  ;;  %v1172_v2 = vpop.f32.mrf.mxu1 }
 0x133   : > { %v1335_v3 = vmax.f32 %v971_v63, 0.0  ;;  %v1385_v4 = vmax.f32 %v1171_v0, 0.0 }
 0x134   : > { %v975_v5 = vpop.f32.mrf.mxu0  ;;  %v1175_v6 = vpop.f32.mrf.mxu1 }
 0x135   : > { %1433 = vst [vmem:[%s2145_s5 + $0x48] sm:$0xff] %v1335_v3  ;;  %1483 = vst [vmem:[%s2145_s5 + $0x1d8] sm:$0xff] %v1385_v4  ;;  %v976_v7 = vadd.f32 %v2136_v51, %v975_v5  ;;  %v1176_v8 = vadd.f32 %v2136_v51, %v1175_v6 }
 0x136   : > { %v977_v9 = vpop.f32.mrf.mxu0  ;;  %v1177_v10 = vpop.f32.mrf.mxu1 }
 0x137   : > { %v1336_v11 = vmax.f32 %v976_v7, 0.0  ;;  %v1386_v12 = vmax.f32 %v1176_v8, 0.0 }
 0x138   : > { %v978_v13 = vpop.f32.mrf.mxu0  ;;  %v1178_v14 = vpop.f32.mrf.mxu1 }
 0x139   : > { %1434 = vst [vmem:[%s2145_s5 + $0x50] sm:$0xff] %v1336_v11  ;;  %1484 = vst [vmem:[%s2145_s5 + $0x1e0] sm:$0xff] %v1386_v12  ;;  %v979_v15 = vadd.f32 %v2136_v51, %v978_v13  ;;  %v1179_v16 = vadd.f32 %v2136_v51, %v1178_v14 }
 0x13a   : > { %v980_v17 = vpop.f32.mrf.mxu0  ;;  %v1180_v18 = vpop.f32.mrf.mxu1 }
 0x13b   : > { %v1337_v19 = vmax.f32 %v979_v15, 0.0  ;;  %v1387_v20 = vmax.f32 %v1179_v16, 0.0 }
 0x13c   : > { %v983_v21 = vpop.f32.mrf.mxu0  ;;  %v1183_v22 = vpop.f32.mrf.mxu1 }
 0x13d   : > { %1435 = vst [vmem:[%s2145_s5 + $0x58] sm:$0xff] %v1337_v19  ;;  %1485 = vst [vmem:[%s2145_s5 + $0x1e8] sm:$0xff] %v1387_v20  ;;  %v984_v23 = vadd.f32 %v2136_v51, %v983_v21  ;;  %v1184_v24 = vadd.f32 %v2136_v51, %v1183_v22 }
 0x13e   : > { %v985_v25 = vpop.f32.mrf.mxu0  ;;  %v1185_v26 = vpop.f32.mrf.mxu1 }
 0x13f   : > { %v1338_v27 = vmax.f32 %v984_v23, 0.0  ;;  %v1388_v28 = vmax.f32 %v1184_v24, 0.0 }
 0x140   : > { %v986_v29 = vpop.f32.mrf.mxu0  ;;  %v1186_v30 = vpop.f32.mrf.mxu1 }
 0x141   : > { %1436 = vst [vmem:[%s2145_s5 + $0x60] sm:$0xff] %v1338_v27  ;;  %1486 = vst [vmem:[%s2145_s5 + $0x1f0] sm:$0xff] %v1388_v28  ;;  %v987_v31 = vadd.f32 %v2136_v51, %v986_v29  ;;  %v1187_v32 = vadd.f32 %v2136_v51, %v1186_v30 }
 0x142   : > { %v988_v33 = vpop.f32.mrf.mxu0  ;;  %v1188_v34 = vpop.f32.mrf.mxu1 }
 0x143   : > { %v1339_v35 = vmax.f32 %v987_v31, 0.0  ;;  %v1389_v36 = vmax.f32 %v1187_v32, 0.0 }
 0x144   : > { %v991_v37 = vpop.f32.mrf.mxu0  ;;  %v1191_v38 = vpop.f32.mrf.mxu1 }
 0x145   : > { %1437 = vst [vmem:[%s2145_s5 + $0x68] sm:$0xff] %v1339_v35  ;;  %1487 = vst [vmem:[%s2145_s5 + $0x1f8] sm:$0xff] %v1389_v36  ;;  %v992_v39 = vadd.f32 %v2136_v51, %v991_v37  ;;  %v1192_v40 = vadd.f32 %v2136_v51, %v1191_v38 }
 0x146   : > { %v993_v41 = vpop.f32.mrf.mxu0  ;;  %v1193_v42 = vpop.f32.mrf.mxu1 }
 0x147   : > { %v1340_v43 = vmax.f32 %v992_v39, 0.0  ;;  %v1390_v44 = vmax.f32 %v1192_v40, 0.0 }
 0x148   : > { %v994_v45 = vpop.f32.mrf.mxu0  ;;  %v1194_v46 = vpop.f32.mrf.mxu1 }
 0x149   : > { %1438 = vst [vmem:[%s2145_s5 + $0x70] sm:$0xff] %v1340_v43  ;;  %1488 = vst [vmem:[%s2145_s5 + $0x200] sm:$0xff] %v1390_v44  ;;  %v995_v47 = vadd.f32 %v2136_v51, %v994_v45  ;;  %v1195_v48 = vadd.f32 %v2136_v51, %v1194_v46 }
 0x14a   : > { %v996_v49 = vpop.f32.mrf.mxu0  ;;  %v1196_v50 = vpop.f32.mrf.mxu1 }
 0x14b   : > { %v1341_v52 = vmax.f32 %v995_v47, 0.0  ;;  %v1391_v53 = vmax.f32 %v1195_v48, 0.0 }
 0x14c   : > { %v999_v54 = vpop.f32.mrf.mxu0  ;;  %v1199_v55 = vpop.f32.mrf.mxu1 }
 0x14d   : > { %1439 = vst [vmem:[%s2145_s5 + $0x78] sm:$0xff] %v1341_v52  ;;  %1489 = vst [vmem:[%s2145_s5 + $0x208] sm:$0xff] %v1391_v53  ;;  %v1000_v56 = vadd.f32 %v2136_v51, %v999_v54  ;;  %v1200_v57 = vadd.f32 %v2136_v51, %v1199_v55 }
 0x14e   : > { %v1001_v58 = vpop.f32.mrf.mxu0  ;;  %v1201_v59 = vpop.f32.mrf.mxu1 }
 0x14f   : > { %v1342_v60 = vmax.f32 %v1000_v56, 0.0  ;;  %v1392_v61 = vmax.f32 %v1200_v57, 0.0 }
 0x150   : > { %v1002_v62 = vpop.f32.mrf.mxu0  ;;  %v1202_v63 = vpop.f32.mrf.mxu1 }
 0x151   : > { %1440 = vst [vmem:[%s2145_s5 + $0x80] sm:$0xff] %v1342_v60  ;;  %1490 = vst [vmem:[%s2145_s5 + $0x210] sm:$0xff] %v1392_v61  ;;  %v1003_v0 = vadd.f32 %v2136_v51, %v1002_v62  ;;  %v1203_v1 = vadd.f32 %v2136_v51, %v1202_v63 }
 0x152   : > { %v1004_v2 = vpop.f32.mrf.mxu0  ;;  %v1204_v3 = vpop.f32.mrf.mxu1 }
 0x153   : > { %v1343_v4 = vmax.f32 %v1003_v0, 0.0  ;;  %v1393_v5 = vmax.f32 %v1203_v1, 0.0 }
 0x154   : > { %v1007_v6 = vpop.f32.mrf.mxu0  ;;  %v1207_v7 = vpop.f32.mrf.mxu1 }
 0x155   : > { %1441 = vst [vmem:[%s2145_s5 + $0x88] sm:$0xff] %v1343_v4  ;;  %1491 = vst [vmem:[%s2145_s5 + $0x218] sm:$0xff] %v1393_v5  ;;  %v1008_v8 = vadd.f32 %v2136_v51, %v1007_v6  ;;  %v1208_v9 = vadd.f32 %v2136_v51, %v1207_v7 }
 0x156   : > { %v1009_v10 = vpop.f32.mrf.mxu0  ;;  %v1209_v11 = vpop.f32.mrf.mxu1 }
 0x157   : > { %v1344_v12 = vmax.f32 %v1008_v8, 0.0  ;;  %v1394_v13 = vmax.f32 %v1208_v9, 0.0 }
 0x158   : > { %v1010_v14 = vpop.f32.mrf.mxu0  ;;  %v1210_v15 = vpop.f32.mrf.mxu1 }
 0x159   : > { %1442 = vst [vmem:[%s2145_s5 + $0x90] sm:$0xff] %v1344_v12  ;;  %1492 = vst [vmem:[%s2145_s5 + $0x220] sm:$0xff] %v1394_v13  ;;  %v1011_v16 = vadd.f32 %v2136_v51, %v1010_v14  ;;  %v1211_v17 = vadd.f32 %v2136_v51, %v1210_v15 }
 0x15a   : > { %v1012_v18 = vpop.f32.mrf.mxu0  ;;  %v1212_v19 = vpop.f32.mrf.mxu1 }
 0x15b   : > { %v1345_v20 = vmax.f32 %v1011_v16, 0.0  ;;  %v1395_v21 = vmax.f32 %v1211_v17, 0.0 }
 0x15c   : > { %v1015_v22 = vpop.f32.mrf.mxu0  ;;  %v1215_v23 = vpop.f32.mrf.mxu1 }
 0x15d   : > { %1443 = vst [vmem:[%s2145_s5 + $0x98] sm:$0xff] %v1345_v20  ;;  %1493 = vst [vmem:[%s2145_s5 + $0x228] sm:$0xff] %v1395_v21  ;;  %v1016_v24 = vadd.f32 %v2136_v51, %v1015_v22  ;;  %v1216_v25 = vadd.f32 %v2136_v51, %v1215_v23 }
 0x15e   : > { %v1017_v26 = vpop.f32.mrf.mxu0  ;;  %v1217_v27 = vpop.f32.mrf.mxu1 }
 0x15f   : > { %v1346_v28 = vmax.f32 %v1016_v24, 0.0  ;;  %v1396_v29 = vmax.f32 %v1216_v25, 0.0 }
 0x160   : > { %v1018_v30 = vpop.f32.mrf.mxu0  ;;  %v1218_v31 = vpop.f32.mrf.mxu1 }
 0x161   : > { %1444 = vst [vmem:[%s2145_s5 + $0xa0] sm:$0xff] %v1346_v28  ;;  %1494 = vst [vmem:[%s2145_s5 + $0x230] sm:$0xff] %v1396_v29  ;;  %v1019_v32 = vadd.f32 %v2136_v51, %v1018_v30  ;;  %v1219_v33 = vadd.f32 %v2136_v51, %v1218_v31 }
 0x162   : > { %v1020_v34 = vpop.f32.mrf.mxu0  ;;  %v1220_v35 = vpop.f32.mrf.mxu1 }
 0x163   : > { %v1347_v36 = vmax.f32 %v1019_v32, 0.0  ;;  %v1397_v37 = vmax.f32 %v1219_v33, 0.0 }
 0x164   : > { %v1023_v38 = vpop.f32.mrf.mxu0  ;;  %v1223_v39 = vpop.f32.mrf.mxu1 }
 0x165   : > { %1445 = vst [vmem:[%s2145_s5 + $0xa8] sm:$0xff] %v1347_v36  ;;  %1495 = vst [vmem:[%s2145_s5 + $0x238] sm:$0xff] %v1397_v37  ;;  %v1024_v40 = vadd.f32 %v2136_v51, %v1023_v38  ;;  %v1224_v41 = vadd.f32 %v2136_v51, %v1223_v39 }
 0x166   : > { %v1025_v42 = vpop.f32.mrf.mxu0  ;;  %v1225_v43 = vpop.f32.mrf.mxu1 }
 0x167   : > { %v1348_v44 = vmax.f32 %v1024_v40, 0.0  ;;  %v1398_v45 = vmax.f32 %v1224_v41, 0.0 }
 0x168   : > { %v1026_v46 = vpop.f32.mrf.mxu0  ;;  %v1226_v47 = vpop.f32.mrf.mxu1 }
 0x169   : > { %1446 = vst [vmem:[%s2145_s5 + $0xb0] sm:$0xff] %v1348_v44  ;;  %1496 = vst [vmem:[%s2145_s5 + $0x240] sm:$0xff] %v1398_v45  ;;  %v1027_v48 = vadd.f32 %v2136_v51, %v1026_v46  ;;  %v1227_v49 = vadd.f32 %v2136_v51, %v1226_v47 }
 0x16a   : > { %v1028_v50 = vpop.f32.mrf.mxu0  ;;  %v1228_v52 = vpop.f32.mrf.mxu1 }
 0x16b   : > { %v1349_v53 = vmax.f32 %v1027_v48, 0.0  ;;  %v1399_v54 = vmax.f32 %v1227_v49, 0.0 }
 0x16c   : > { %v1031_v55 = vpop.f32.mrf.mxu0  ;;  %v1231_v56 = vpop.f32.mrf.mxu1 }
 0x16d   : > { %1447 = vst [vmem:[%s2145_s5 + $0xb8] sm:$0xff] %v1349_v53  ;;  %1497 = vst [vmem:[%s2145_s5 + $0x248] sm:$0xff] %v1399_v54  ;;  %v1032_v57 = vadd.f32 %v2136_v51, %v1031_v55  ;;  %v1232_v58 = vadd.f32 %v2136_v51, %v1231_v56 }
 0x16e   : > { %v1033_v59 = vpop.f32.mrf.mxu0  ;;  %v1233_v60 = vpop.f32.mrf.mxu1 }
 0x16f   : > { %v1350_v61 = vmax.f32 %v1032_v57, 0.0  ;;  %v1400_v62 = vmax.f32 %v1232_v58, 0.0 }
 0x170   : > { %v1034_v63 = vpop.f32.mrf.mxu0  ;;  %v1234_v0 = vpop.f32.mrf.mxu1 }
 0x171   : > { %1448 = vst [vmem:[%s2145_s5 + $0xc0] sm:$0xff] %v1350_v61  ;;  %1498 = vst [vmem:[%s2145_s5 + $0x250] sm:$0xff] %v1400_v62  ;;  %v1035_v1 = vadd.f32 %v2136_v51, %v1034_v63  ;;  %v1235_v2 = vadd.f32 %v2136_v51, %v1234_v0 }
 0x172   : > { %v1036_v3 = vpop.f32.mrf.mxu0  ;;  %v1236_v4 = vpop.f32.mrf.mxu1 }
 0x173   : > { %v1351_v5 = vmax.f32 %v1035_v1, 0.0  ;;  %v1401_v6 = vmax.f32 %v1235_v2, 0.0 }
 0x174   : > { %v1039_v7 = vpop.f32.mrf.mxu0  ;;  %v1239_v8 = vpop.f32.mrf.mxu1 }
 0x175   : > { %1449 = vst [vmem:[%s2145_s5 + $0xc8] sm:$0xff] %v1351_v5  ;;  %1499 = vst [vmem:[%s2145_s5 + $0x258] sm:$0xff] %v1401_v6  ;;  %v1040_v9 = vadd.f32 %v2136_v51, %v1039_v7  ;;  %v1240_v10 = vadd.f32 %v2136_v51, %v1239_v8 }
 0x176   : > { %v1041_v11 = vpop.f32.mrf.mxu0  ;;  %v1241_v12 = vpop.f32.mrf.mxu1 }
 0x177   : > { %v1352_v13 = vmax.f32 %v1040_v9, 0.0  ;;  %v1402_v14 = vmax.f32 %v1240_v10, 0.0 }
 0x178   : > { %v1042_v15 = vpop.f32.mrf.mxu0  ;;  %v1242_v16 = vpop.f32.mrf.mxu1 }
 0x179   : > { %1450 = vst [vmem:[%s2145_s5 + $0xd0] sm:$0xff] %v1352_v13  ;;  %1500 = vst [vmem:[%s2145_s5 + $0x260] sm:$0xff] %v1402_v14  ;;  %v1043_v17 = vadd.f32 %v2136_v51, %v1042_v15  ;;  %v1243_v18 = vadd.f32 %v2136_v51, %v1242_v16 }
 0x17a   : > { %v1044_v19 = vpop.f32.mrf.mxu0  ;;  %v1244_v20 = vpop.f32.mrf.mxu1 }
 0x17b   : > { %v1353_v21 = vmax.f32 %v1043_v17, 0.0  ;;  %v1403_v22 = vmax.f32 %v1243_v18, 0.0 }
 0x17c   : > { %v1047_v23 = vpop.f32.mrf.mxu0  ;;  %v1247_v24 = vpop.f32.mrf.mxu1 }
 0x17d   : > { %1451 = vst [vmem:[%s2145_s5 + $0xd8] sm:$0xff] %v1353_v21  ;;  %1501 = vst [vmem:[%s2145_s5 + $0x268] sm:$0xff] %v1403_v22  ;;  %v1048_v25 = vadd.f32 %v2136_v51, %v1047_v23  ;;  %v1248_v26 = vadd.f32 %v2136_v51, %v1247_v24 }
 0x17e   : > { %v1049_v27 = vpop.f32.mrf.mxu0  ;;  %v1249_v28 = vpop.f32.mrf.mxu1 }
 0x17f   : > { %v1354_v29 = vmax.f32 %v1048_v25, 0.0  ;;  %v1404_v30 = vmax.f32 %v1248_v26, 0.0 }
 0x180   : > { %v1050_v31 = vpop.f32.mrf.mxu0  ;;  %v1250_v32 = vpop.f32.mrf.mxu1 }
 0x181   : > { %1452 = vst [vmem:[%s2145_s5 + $0xe0] sm:$0xff] %v1354_v29  ;;  %1502 = vst [vmem:[%s2145_s5 + $0x270] sm:$0xff] %v1404_v30  ;;  %v1051_v33 = vadd.f32 %v2136_v51, %v1050_v31  ;;  %v1251_v34 = vadd.f32 %v2136_v51, %v1250_v32 }
 0x182   : > { %v1052_v35 = vpop.f32.mrf.mxu0  ;;  %v1252_v36 = vpop.f32.mrf.mxu1 }
 0x183   : > { %v1355_v37 = vmax.f32 %v1051_v33, 0.0  ;;  %v1405_v38 = vmax.f32 %v1251_v34, 0.0 }
 0x184   : > { %v1055_v39 = vpop.f32.mrf.mxu0  ;;  %v1255_v40 = vpop.f32.mrf.mxu1 }
 0x185   : > { %1453 = vst [vmem:[%s2145_s5 + $0xe8] sm:$0xff] %v1355_v37  ;;  %1503 = vst [vmem:[%s2145_s5 + $0x278] sm:$0xff] %v1405_v38  ;;  %v1056_v41 = vadd.f32 %v2136_v51, %v1055_v39  ;;  %v1256_v42 = vadd.f32 %v2136_v51, %v1255_v40 }
 0x186   : > { %v1057_v43 = vpop.f32.mrf.mxu0  ;;  %v1257_v44 = vpop.f32.mrf.mxu1 }
 0x187   : > { %v1356_v45 = vmax.f32 %v1056_v41, 0.0  ;;  %v1406_v46 = vmax.f32 %v1256_v42, 0.0 }
 0x188   : > { %v1058_v47 = vpop.f32.mrf.mxu0  ;;  %v1258_v48 = vpop.f32.mrf.mxu1 }
 0x189   : > { %1454 = vst [vmem:[%s2145_s5 + $0xf0] sm:$0xff] %v1356_v45  ;;  %1504 = vst [vmem:[%s2145_s5 + $0x280] sm:$0xff] %v1406_v46  ;;  %v1059_v49 = vadd.f32 %v2136_v51, %v1058_v47  ;;  %v1259_v50 = vadd.f32 %v2136_v51, %v1258_v48 }
 0x18a   : > { %v1060_v52 = vpop.f32.mrf.mxu0  ;;  %v1260_v53 = vpop.f32.mrf.mxu1 }
 0x18b   : > { %v1357_v54 = vmax.f32 %v1059_v49, 0.0  ;;  %v1407_v55 = vmax.f32 %v1259_v50, 0.0 }
 0x18c   : > { %v1063_v56 = vpop.f32.mrf.mxu0  ;;  %v1263_v57 = vpop.f32.mrf.mxu1 }
 0x18d   : > { %1455 = vst [vmem:[%s2145_s5 + $0xf8] sm:$0xff] %v1357_v54  ;;  %1505 = vst [vmem:[%s2145_s5 + $0x288] sm:$0xff] %v1407_v55  ;;  %v1064_v58 = vadd.f32 %v2136_v51, %v1063_v56  ;;  %v1264_v59 = vadd.f32 %v2136_v51, %v1263_v57 }
 0x18e   : > { %v1065_v60 = vpop.f32.mrf.mxu0  ;;  %v1265_v61 = vpop.f32.mrf.mxu1 }
 0x18f   : > { %v1358_v62 = vmax.f32 %v1064_v58, 0.0  ;;  %v1408_v63 = vmax.f32 %v1264_v59, 0.0 }
 0x190   : > { %v1066_v0 = vpop.f32.mrf.mxu0  ;;  %v1266_v1 = vpop.f32.mrf.mxu1 }
 0x191   : > { %1456 = vst [vmem:[%s2145_s5 + $0x100] sm:$0xff] %v1358_v62  ;;  %1506 = vst [vmem:[%s2145_s5 + $0x290] sm:$0xff] %v1408_v63  ;;  %v1067_v2 = vadd.f32 %v2136_v51, %v1066_v0  ;;  %v1267_v3 = vadd.f32 %v2136_v51, %v1266_v1 }
 0x192   : > { %v1068_v4 = vpop.f32.mrf.mxu0  ;;  %v1268_v5 = vpop.f32.mrf.mxu1 }
 0x193   : > { %v1359_v6 = vmax.f32 %v1067_v2, 0.0  ;;  %v1409_v7 = vmax.f32 %v1267_v3, 0.0 }
 0x194   : > { %v1071_v8 = vpop.f32.mrf.mxu0  ;;  %v1271_v9 = vpop.f32.mrf.mxu1 }
 0x195   : > { %1457 = vst [vmem:[%s2145_s5 + $0x108] sm:$0xff] %v1359_v6  ;;  %1507 = vst [vmem:[%s2145_s5 + $0x298] sm:$0xff] %v1409_v7  ;;  %v1072_v10 = vadd.f32 %v2136_v51, %v1071_v8  ;;  %v1272_v11 = vadd.f32 %v2136_v51, %v1271_v9 }
 0x196   : > { %v1073_v12 = vpop.f32.mrf.mxu0  ;;  %v1273_v13 = vpop.f32.mrf.mxu1 }
 0x197   : > { %v1360_v14 = vmax.f32 %v1072_v10, 0.0  ;;  %v1410_v15 = vmax.f32 %v1272_v11, 0.0 }
 0x198   : > { %v1074_v16 = vpop.f32.mrf.mxu0  ;;  %v1274_v17 = vpop.f32.mrf.mxu1 }
 0x199   : > { %1458 = vst [vmem:[%s2145_s5 + $0x110] sm:$0xff] %v1360_v14  ;;  %1508 = vst [vmem:[%s2145_s5 + $0x2a0] sm:$0xff] %v1410_v15  ;;  %v1075_v18 = vadd.f32 %v2136_v51, %v1074_v16  ;;  %v1275_v19 = vadd.f32 %v2136_v51, %v1274_v17 }
 0x19a   : > { %v1076_v20 = vpop.f32.mrf.mxu0  ;;  %v1276_v21 = vpop.f32.mrf.mxu1 }
 0x19b   : > { %v1361_v22 = vmax.f32 %v1075_v18, 0.0  ;;  %v1411_v23 = vmax.f32 %v1275_v19, 0.0 }
 0x19c   : > { %v1079_v24 = vpop.f32.mrf.mxu0  ;;  %v1279_v25 = vpop.f32.mrf.mxu1 }
 0x19d   : > { %1459 = vst [vmem:[%s2145_s5 + $0x118] sm:$0xff] %v1361_v22  ;;  %1509 = vst [vmem:[%s2145_s5 + $0x2a8] sm:$0xff] %v1411_v23  ;;  %v1080_v26 = vadd.f32 %v2136_v51, %v1079_v24  ;;  %v1280_v27 = vadd.f32 %v2136_v51, %v1279_v25 }
 0x19e   : > { %v1081_v28 = vpop.f32.mrf.mxu0  ;;  %v1281_v29 = vpop.f32.mrf.mxu1 }
 0x19f   : > { %v1362_v30 = vmax.f32 %v1080_v26, 0.0  ;;  %v1412_v31 = vmax.f32 %v1280_v27, 0.0 }
 0x1a0   : > { %v1082_v32 = vpop.f32.mrf.mxu0  ;;  %v1282_v33 = vpop.f32.mrf.mxu1 }
 0x1a1   : > { %1460 = vst [vmem:[%s2145_s5 + $0x120] sm:$0xff] %v1362_v30  ;;  %1510 = vst [vmem:[%s2145_s5 + $0x2b0] sm:$0xff] %v1412_v31  ;;  %v1083_v34 = vadd.f32 %v2136_v51, %v1082_v32  ;;  %v1283_v35 = vadd.f32 %v2136_v51, %v1282_v33 }
 0x1a2   : > { %v1084_v36 = vpop.f32.mrf.mxu0  ;;  %v1284_v37 = vpop.f32.mrf.mxu1 }
 0x1a3   : > { %v1363_v38 = vmax.f32 %v1083_v34, 0.0  ;;  %v1413_v39 = vmax.f32 %v1283_v35, 0.0 }
 0x1a4   : > { %v1087_v40 = vpop.f32.mrf.mxu0  ;;  %v1287_v41 = vpop.f32.mrf.mxu1 }
 0x1a5   : > { %1461 = vst [vmem:[%s2145_s5 + $0x128] sm:$0xff] %v1363_v38  ;;  %1511 = vst [vmem:[%s2145_s5 + $0x2b8] sm:$0xff] %v1413_v39  ;;  %v1088_v42 = vadd.f32 %v2136_v51, %v1087_v40  ;;  %v1288_v43 = vadd.f32 %v2136_v51, %v1287_v41 }
 0x1a6   : > { %v1089_v44 = vpop.f32.mrf.mxu0  ;;  %v1289_v45 = vpop.f32.mrf.mxu1 }
 0x1a7   : > { %v1364_v46 = vmax.f32 %v1088_v42, 0.0  ;;  %v1414_v47 = vmax.f32 %v1288_v43, 0.0 }
 0x1a8   : > { %v1090_v48 = vpop.f32.mrf.mxu0  ;;  %v1290_v49 = vpop.f32.mrf.mxu1 }
 0x1a9   : > { %1462 = vst [vmem:[%s2145_s5 + $0x130] sm:$0xff] %v1364_v46  ;;  %1512 = vst [vmem:[%s2145_s5 + $0x2c0] sm:$0xff] %v1414_v47  ;;  %v1091_v50 = vadd.f32 %v2136_v51, %v1090_v48  ;;  %v1291_v52 = vadd.f32 %v2136_v51, %v1290_v49 }
 0x1aa   : > { %v1092_v53 = vpop.f32.mrf.mxu0  ;;  %v1292_v54 = vpop.f32.mrf.mxu1 }
 0x1ab   : > { %v1365_v55 = vmax.f32 %v1091_v50, 0.0  ;;  %v1415_v56 = vmax.f32 %v1291_v52, 0.0 }
 0x1ac   : > { %v1095_v57 = vpop.f32.mrf.mxu0  ;;  %v1295_v58 = vpop.f32.mrf.mxu1 }
 0x1ad   : > { %1463 = vst [vmem:[%s2145_s5 + $0x138] sm:$0xff] %v1365_v55  ;;  %1513 = vst [vmem:[%s2145_s5 + $0x2c8] sm:$0xff] %v1415_v56  ;;  %v1096_v59 = vadd.f32 %v2136_v51, %v1095_v57  ;;  %v1296_v60 = vadd.f32 %v2136_v51, %v1295_v58 }
 0x1ae   : > { %v1097_v61 = vpop.f32.mrf.mxu0  ;;  %v1297_v62 = vpop.f32.mrf.mxu1 }
 0x1af   : > { %v1366_v63 = vmax.f32 %v1096_v59, 0.0  ;;  %v1416_v0 = vmax.f32 %v1296_v60, 0.0 }
 0x1b0   : > { %v1098_v1 = vpop.f32.mrf.mxu0  ;;  %v1298_v2 = vpop.f32.mrf.mxu1 }
 0x1b1   : > { %1464 = vst [vmem:[%s2145_s5 + $0x140] sm:$0xff] %v1366_v63  ;;  %1514 = vst [vmem:[%s2145_s5 + $0x2d0] sm:$0xff] %v1416_v0  ;;  %v1099_v3 = vadd.f32 %v2136_v51, %v1098_v1  ;;  %v1299_v4 = vadd.f32 %v2136_v51, %v1298_v2 }
 0x1b2   : > { %v1100_v5 = vpop.f32.mrf.mxu0  ;;  %v1300_v6 = vpop.f32.mrf.mxu1 }
 0x1b3   : > { %v1367_v7 = vmax.f32 %v1099_v3, 0.0  ;;  %v1417_v8 = vmax.f32 %v1299_v4, 0.0 }
 0x1b4   : > { %v1103_v9 = vpop.f32.mrf.mxu0  ;;  %v1303_v10 = vpop.f32.mrf.mxu1 }
 0x1b5   : > { %1465 = vst [vmem:[%s2145_s5 + $0x148] sm:$0xff] %v1367_v7  ;;  %1515 = vst [vmem:[%s2145_s5 + $0x2d8] sm:$0xff] %v1417_v8  ;;  %v1104_v11 = vadd.f32 %v2136_v51, %v1103_v9  ;;  %v1304_v12 = vadd.f32 %v2136_v51, %v1303_v10 }
 0x1b6   : > { %v1105_v13 = vpop.f32.mrf.mxu0  ;;  %v1305_v14 = vpop.f32.mrf.mxu1 }
 0x1b7   : > { %v1368_v15 = vmax.f32 %v1104_v11, 0.0  ;;  %v1418_v16 = vmax.f32 %v1304_v12, 0.0 }
 0x1b8   : > { %v1106_v17 = vpop.f32.mrf.mxu0  ;;  %v1306_v18 = vpop.f32.mrf.mxu1 }
 0x1b9   : > { %1466 = vst [vmem:[%s2145_s5 + $0x150] sm:$0xff] %v1368_v15  ;;  %1516 = vst [vmem:[%s2145_s5 + $0x2e0] sm:$0xff] %v1418_v16  ;;  %v1107_v19 = vadd.f32 %v2136_v51, %v1106_v17  ;;  %v1307_v20 = vadd.f32 %v2136_v51, %v1306_v18 }
 0x1ba   : > { %v1108_v21 = vpop.f32.mrf.mxu0  ;;  %v1308_v22 = vpop.f32.mrf.mxu1 }
 0x1bb   : > { %v1369_v23 = vmax.f32 %v1107_v19, 0.0  ;;  %v1419_v24 = vmax.f32 %v1307_v20, 0.0 }
 0x1bc   : > { %v1111_v25 = vpop.f32.mrf.mxu0  ;;  %v1311_v26 = vpop.f32.mrf.mxu1 }
 0x1bd   : > { %1467 = vst [vmem:[%s2145_s5 + $0x158] sm:$0xff] %v1369_v23  ;;  %1517 = vst [vmem:[%s2145_s5 + $0x2e8] sm:$0xff] %v1419_v24  ;;  %v1112_v27 = vadd.f32 %v2136_v51, %v1111_v25  ;;  %v1312_v28 = vadd.f32 %v2136_v51, %v1311_v26 }
 0x1be   : > { %v1113_v29 = vpop.f32.mrf.mxu0  ;;  %v1313_v30 = vpop.f32.mrf.mxu1 }
 0x1bf   : > { %v1370_v31 = vmax.f32 %v1112_v27, 0.0  ;;  %v1420_v32 = vmax.f32 %v1312_v28, 0.0 }
 0x1c0   : > { %v1114_v33 = vpop.f32.mrf.mxu0  ;;  %v1314_v34 = vpop.f32.mrf.mxu1 }
 0x1c1   : > { %1468 = vst [vmem:[%s2145_s5 + $0x160] sm:$0xff] %v1370_v31  ;;  %1518 = vst [vmem:[%s2145_s5 + $0x2f0] sm:$0xff] %v1420_v32  ;;  %v1115_v35 = vadd.f32 %v2136_v51, %v1114_v33  ;;  %v1315_v36 = vadd.f32 %v2136_v51, %v1314_v34 }
 0x1c2   : > { %v1116_v37 = vpop.f32.mrf.mxu0  ;;  %v1316_v38 = vpop.f32.mrf.mxu1 }
 0x1c3   : > { %v1371_v39 = vmax.f32 %v1115_v35, 0.0  ;;  %v1421_v40 = vmax.f32 %v1315_v36, 0.0 }
 0x1c4   : > { %v1119_v41 = vpop.f32.mrf.mxu0  ;;  %v1319_v42 = vpop.f32.mrf.mxu1 }
 0x1c5   : > { %1469 = vst [vmem:[%s2145_s5 + $0x168] sm:$0xff] %v1371_v39  ;;  %1519 = vst [vmem:[%s2145_s5 + $0x2f8] sm:$0xff] %v1421_v40  ;;  %v1120_v43 = vadd.f32 %v2136_v51, %v1119_v41  ;;  %v1320_v44 = vadd.f32 %v2136_v51, %v1319_v42 }
 0x1c6   : > { %v1121_v45 = vpop.f32.mrf.mxu0  ;;  %v1321_v46 = vpop.f32.mrf.mxu1 }
 0x1c7   : > { %v1372_v47 = vmax.f32 %v1120_v43, 0.0  ;;  %v1422_v48 = vmax.f32 %v1320_v44, 0.0 }
 0x1c8   : > { %v1122_v49 = vpop.f32.mrf.mxu0  ;;  %v1322_v50 = vpop.f32.mrf.mxu1 }
 0x1c9   : > { %1470 = vst [vmem:[%s2145_s5 + $0x170] sm:$0xff] %v1372_v47  ;;  %1520 = vst [vmem:[%s2145_s5 + $0x300] sm:$0xff] %v1422_v48  ;;  %v1123_v52 = vadd.f32 %v2136_v51, %v1122_v49  ;;  %v1323_v53 = vadd.f32 %v2136_v51, %v1322_v50 }
 0x1ca   : > { %v1124_v54 = vpop.f32.mrf.mxu0  ;;  %v1324_v55 = vpop.f32.mrf.mxu1 }
 0x1cb   : > { %v1373_v56 = vmax.f32 %v1123_v52, 0.0  ;;  %v1423_v57 = vmax.f32 %v1323_v53, 0.0 }
 0x1cc   : > { %v1127_v58 = vpop.f32.mrf.mxu0 }
 0x1cd   : > { %1471 = vst [vmem:[%s2145_s5 + $0x178] sm:$0xff] %v1373_v56  ;;  %1521 = vst [vmem:[%s2145_s5 + $0x308] sm:$0xff] %v1423_v57  ;;  %v1128_v59 = vadd.f32 %v2136_v51, %v1127_v58 }
 0x1ce   : > { %v1129_v60 = vpop.f32.mrf.mxu0 }
 0x1cf   : > { %v1374_v61 = vmax.f32 %v1128_v59, 0.0 }
 0x1d0   : > { %v1130_v62 = vpop.f32.mrf.mxu0 }
 0x1d1   : > { %1472 = vst [vmem:[%s2145_s5 + $0x180] sm:$0xff] %v1374_v61  ;;  %v1131_v63 = vadd.f32 %v2136_v51, %v1130_v62 }
 0x1d2   : > { %v1132_v0 = vpop.f32.mrf.mxu0 }
 0x1d3   : > { %v1375_v1 = vmax.f32 %v1131_v63, 0.0 }
 0x1d5   : > { %1473 = vst [vmem:[%s2145_s5 + $0x188] sm:$0xff] %v1375_v1 }
 0x1d6 PF: > { %s13_s12 = sadd.s32 1, %s1914_s12  }
 0x1d7   : > { %p10_p4 = scmp.ge.s32.totalorder %s13_s12, 6  }
 0x1d9   :  { %12 = sbr.rel (!%p10_p4) target bundleno = 1 (0x1), region = 62 }

// kernel: simplenet_forward.4
= control target key start
LH: loop header
LB: loop body
LE: loop exit
PB: predicated region body
PF: predicated region fallthrough
CT: control target
= control target key end

     0   :  { %s1880_s12 = smov 0   ;;  %s2236_s0 = inlined_call_operand.vmem [shape: bf16[384,576], index: 0, kind: input, shape index: {}]   ;;  %s2237_s1 = inlined_call_operand.vmem [shape: bf16[576,128], index: 1, kind: input, shape index: {}]   ;;  %s2238_s2 = inlined_call_operand.vmem [shape: f32[1,128], index: 2, kind: input, shape index: {}]   ;;  %s2239_s3 = inlined_call_operand.vmem [shape: f32[384,128], index: 3, kind: output, shape index: {}]  }
   0x1 LB: > { %s1373_s13 = sadd.s32 4294967295, %s1858_s12   ;;  %p1377_p0 = scmp.ge.s32.totalorder %s1858_s12, 1  ;;  %s1858_s12 = sphi %s1880_s12, %s13_s12  }
   0x2   : > { %p139_p1 = scmp.lt.s32.totalorder %s1858_s12, 3 }
   0x4   : > { %p140_p2 = pnand %p1377_p0, %p139_p1 }
   0x6   : > { %143 = sbr.rel (%p140_p2) target bundleno = 362 (0x16a), region = 32 }
   0xb   : > { %v1732_v0 = vld [vmem:[%s2237_s1 + $0x78] sm:$0xff]   ;;  %v1736_v4 = vld [vmem:[%s2237_s1 + $0x70] sm:$0xff]   ;;  %v1740_v8 = vld [vmem:[%s2237_s1 + $0x68] sm:$0xff]   ;;  %s164_s17 = smul.u32 24, %s1373_s13  ;;  %vm845_vm0 = vcmask 523264  }
   0xc   : > { %v1733_v1 = vld [vmem:[%s2237_s1 + $0xf8] sm:$0xff]   ;;  %1491 = vmatprep.subr.bf16.mxu0 %v1732_v0  ;;  %v1737_v5 = vld [vmem:[%s2237_s1 + $0xf0] sm:$0xff]   ;;  %v1741_v9 = vld [vmem:[%s2237_s1 + $0xe8] sm:$0xff]  }
   0xd   : > { %v1734_v2 = vld [vmem:[%s2237_s1 + $0x38] sm:$0xff]   ;;  %1579 = vmatprep.subr.bf16.mxu1 %v1733_v1  ;;  %v1738_v6 = vld [vmem:[%s2237_s1 + $0x30] sm:$0xff]   ;;  %v1742_v10 = vld [vmem:[%s2237_s1 + $0x28] sm:$0xff]   ;;  %p165_p3 = scmp.lt.s32.totalorder %s164_s17, 47 }
   0xe   : > { %v1735_v3 = vld [vmem:[%s2237_s1 + $0xb8] sm:$0xff]   ;;  %1492 = vmatpush3.bf16.msra.mxu0 %v1734_v2  ;;  %v1739_v7 = vld [vmem:[%s2237_s1 + $0xb0] sm:$0xff]   ;;  %v1743_v11 = vld [vmem:[%s2237_s1 + $0xa8] sm:$0xff]  }
   0xf   : > { %1580 = vmatpush3.bf16.msra.mxu1 %v1735_v3  ;;  %1493 = vmatprep.subr.bf16.mxu0 %v1736_v4  ;;  %v1744_v12 = vld [vmem:[%s2237_s1 + $0x60] sm:$0xff]   ;;  %v1748_v16 = vld [vmem:[%s2237_s1 + $0x58] sm:$0xff]   ;;  %v1752_v20 = vld [vmem:[%s2237_s1 + $0x50] sm:$0xff]   ;;  %s2251_s17 = smov (!%p165_p3, %s164_s17), 47 }
  0x10   : > { %1581 = vmatprep.subr.bf16.mxu1 %v1737_v5  ;;  %v1745_v13 = vld [vmem:[%s2237_s1 + $0xe0] sm:$0xff]   ;;  %v1749_v17 = vld [vmem:[%s2237_s1 + $0xd8] sm:$0xff]   ;;  %v1753_v21 = vld [vmem:[%s2237_s1 + $0xd0] sm:$0xff]   ;;  %s1723_s16 = smul.u32 20, %s2251_s17  ;;  %s1379_s18 = sshll.u32 %s2251_s17, 3 }
  0x11   : > { %v1746_v14 = vld [vmem:[%s2237_s1 + $0x20] sm:$0xff]   ;;  %v1750_v18 = vld [vmem:[%s2237_s1 + $0x18] sm:$0xff]   ;;  %v1754_v22 = vld [vmem:[%s2237_s1 + $0x10] sm:$0xff]   ;;  %s2168_s21 = scalar_lea.vmem %s2239_s3, %s1379_s18 }
  0x12   : > { %1494 = vmatpush3.bf16.msra.mxu0 %v1738_v6  ;;  %v1747_v15 = vld [vmem:[%s2237_s1 + $0xa0] sm:$0xff]   ;;  %v1751_v19 = vld [vmem:[%s2237_s1 + $0x98] sm:$0xff]   ;;  %v1755_v23 = vld [vmem:[%s2237_s1 + $0x90] sm:$0xff]   ;;  %s1986_s27 = scalar_lea.vmem %s2236_s0, %s1723_s16 }
  0x13   : > { %1582 = vmatpush3.bf16.msra.mxu1 %v1739_v7  ;;  %1495 = vmatprep.subr.bf16.mxu0 %v1740_v8  ;;  %v1756_v24 = vld [vmem:[%s2237_s1 + $0x48] sm:$0xff]   ;;  %v1760_v28 = vld [vmem:[%s2237_s1 + $0x40] sm:$0xff]   ;;  %v1770_v36 = vld [vmem:[%s2237_s1 + $0x118] sm:$0xff]  }
  0x14   : > { %1583 = vmatprep.subr.bf16.mxu1 %v1741_v9  ;;  %v1757_v25 = vld [vmem:[%s2237_s1 + $0xc8] sm:$0xff]   ;;  %v1761_v29 = vld [vmem:[%s2237_s1 + $0xc0] sm:$0xff]   ;;  %v1779_v42 = vld [vmem:[%s1986_s27 + $0x5c] ss:$20 sps:$4 sm:$0xff]  }
  0x15   : > { %v1758_v26 = vld [vmem:[%s2237_s1 + $0x8] sm:$0xff]   ;;  %v1762_v30 = vld [vmem:[%s2237_s1] sm:$0xff]   ;;  %v1789_v43 = vld [vmem:[%s2237_s1 + $0x110] sm:$0xff]  }
  0x16   : > { %1496 = vmatpush3.bf16.msra.mxu0 %v1742_v10  ;;  %v1759_v27 = vld [vmem:[%s2237_s1 + $0x88] sm:$0xff]   ;;  %v1763_v31 = vld [vmem:[%s2237_s1 + $0x80] sm:$0xff]   ;;  %v1783_v46 = vld [vmem:[%s1986_s27 + $0x7c] ss:$20 sps:$4 sm:$0xff]  }
  0x17   : > { %1584 = vmatpush3.bf16.msra.mxu1 %v1743_v11  ;;  %1497 = vmatprep.subr.bf16.mxu0 %v1744_v12  ;;  %v1764_v32 = vld [vmem:[%s1986_s27] ss:$20 sps:$4 sm:$0xff]   ;;  %v1766_v33 = vld [vmem:[%s1986_s27 + $0x4] ss:$20 sps:$4 sm:$0xff]   ;;  %v1767_v34 = vld [vmem:[%s1986_s27 + $0x8] ss:$20 sps:$4 sm:$0xff]  }
  0x18   : > { %1585 = vmatprep.subr.bf16.mxu1 %v1745_v13  ;;  %v1769_v35 = vld [vmem:[%s1986_s27 + $0xc] ss:$20 sps:$4 sm:$0xff]   ;;  %914 = vmatprep.mubr.bf16.mxu0 %v1766_v33  ;;  %v1773_v38 = vld [vmem:[%s1986_s27 + $0x34] ss:$20 sps:$4 sm:$0xff]   ;;  %v1776_v40 = vld [vmem:[%s1986_s27 + $0x30] ss:$20 sps:$4 sm:$0xff]  }
  0x19   : > { %1043 = vmatprep.mubr.bf16.mxu1 %v1769_v35  ;;  %v1771_v37 = vld [vmem:[%s1986_s27 + $0x2c] ss:$20 sps:$4 sm:$0xff]   ;;  %v1775_v39 = vld [vmem:[%s1986_s27 + $0x28] ss:$20 sps:$4 sm:$0xff]   ;;  %v1781_v44 = vld [vmem:[%s1986_s27 + $0x50] ss:$20 sps:$4 sm:$0xff]  }
  0x1a   : > { %1498 = vmatpush3.bf16.msra.mxu0 %v1746_v14  ;;  %v1777_v41 = vld [vmem:[%s1986_s27 + $0x54] ss:$20 sps:$4 sm:$0xff]   ;;  %v1782_v45 = vld [vmem:[%s1986_s27 + $0x58] ss:$20 sps:$4 sm:$0xff]   ;;  %v1827_v53 = vld [vmem:[%s2237_s1 + $0x100] sm:$0xff]  }
  0x1b   : > { %1586 = vmatpush3.bf16.msra.mxu1 %v1747_v15  ;;  %1499 = vmatprep.subr.bf16.mxu0 %v1748_v16  ;;  %v1785_v47 = vld [vmem:[%s1986_s27 + $0x84] ss:$20 sps:$4 sm:$0xff]   ;;  %v1808_v48 = vld [vmem:[%s2237_s1 + $0x108] sm:$0xff]   ;;  %v1788_v50 = vld [vmem:[%s1986_s27 + $0x80] ss:$20 sps:$4 sm:$0xff]  }
  0x1c   : > { %1587 = vmatprep.subr.bf16.mxu1 %v1749_v17  ;;  %v1787_v49 = vld [vmem:[%s1986_s27 + $0x78] ss:$20 sps:$4 sm:$0xff]   ;;  %v1794_v54 = vld [vmem:[%s1986_s27 + $0xa0] ss:$20 sps:$4 sm:$0xff]   ;;  %v1795_v55 = vld [vmem:[%s1986_s27 + $0xa8] ss:$20 sps:$4 sm:$0xff]  }
  0x1d   : > { %v1790_v51 = vld [vmem:[%s1986_s27 + $0xa4] ss:$20 sps:$4 sm:$0xff]   ;;  %v1792_v52 = vld [vmem:[%s1986_s27 + $0xac] ss:$20 sps:$4 sm:$0xff]   ;;  %v1798_v57 = vld [vmem:[%s1986_s27 + $0xd4] ss:$20 sps:$4 sm:$0xff]  }
  0x1e   : > { %1500 = vmatpush3.bf16.msra.mxu0 %v1750_v18  ;;  %v1796_v56 = vld [vmem:[%s1986_s27 + $0xcc] ss:$20 sps:$4 sm:$0xff]   ;;  %v1800_v58 = vld [vmem:[%s1986_s27 + $0xc8] ss:$20 sps:$4 sm:$0xff]   ;;  %v1801_v59 = vld [vmem:[%s1986_s27 + $0xd0] ss:$20 sps:$4 sm:$0xff]  }
  0x1f   : > { %1588 = vmatpush3.bf16.msra.mxu1 %v1751_v19  ;;  %1501 = vmatprep.subr.bf16.mxu0 %v1752_v20  ;;  %v1802_v60 = vld [vmem:[%s1986_s27 + $0xf4] ss:$20 sps:$4 sm:$0xff]   ;;  %v1804_v61 = vld [vmem:[%s1986_s27 + $0xfc] ss:$20 sps:$4 sm:$0xff]   ;;  %v1807_v63 = vld [vmem:[%s1986_s27 + $0xf8] ss:$20 sps:$4 sm:$0xff]  }
  0x20   : > { %1589 = vmatprep.subr.bf16.mxu1 %v1753_v21  ;;  %v1806_v62 = vld [vmem:[%s1986_s27 + $0xf0] ss:$20 sps:$4 sm:$0xff]   ;;  %v1813_v2 = vld [vmem:[%s1986_s27 + $0x118] ss:$20 sps:$4 sm:$0xff]   ;;  %v1814_v3 = vld [vmem:[%s1986_s27 + $0x120] ss:$20 sps:$4 sm:$0xff]  }
  0x21   : > { %v1809_v0 = vld [vmem:[%s1986_s27 + $0x11c] ss:$20 sps:$4 sm:$0xff]   ;;  %v1811_v1 = vld [vmem:[%s1986_s27 + $0x124] ss:$20 sps:$4 sm:$0xff]   ;;  %v1817_v5 = vld [vmem:[%s1986_s27 + $0x14c] ss:$20 sps:$4 sm:$0xff]  }
  0x22   : > { %1502 = vmatpush3.bf16.msra.mxu0 %v1754_v22  ;;  %v1815_v4 = vld [vmem:[%s1986_s27 + $0x144] ss:$20 sps:$4 sm:$0xff]   ;;  %v1819_v6 = vld [vmem:[%s1986_s27 + $0x140] ss:$20 sps:$4 sm:$0xff]   ;;  %v1820_v7 = vld [vmem:[%s1986_s27 + $0x148] ss:$20 sps:$4 sm:$0xff]  }
  0x23   : > { %1590 = vmatpush3.bf16.msra.mxu1 %v1755_v23  ;;  %1503 = vmatprep.subr.bf16.mxu0 %v1756_v24  ;;  %v1821_v8 = vld [vmem:[%s1986_s27 + $0x16c] ss:$20 sps:$4 sm:$0xff]   ;;  %v1823_v9 = vld [vmem:[%s1986_s27 + $0x174] ss:$20 sps:$4 sm:$0xff]   ;;  %v1826_v11 = vld [vmem:[%s1986_s27 + $0x170] ss:$20 sps:$4 sm:$0xff]  }
  0x24   : > { %1591 = vmatprep.subr.bf16.mxu1 %v1757_v25  ;;  %v1825_v10 = vld [vmem:[%s1986_s27 + $0x168] ss:$20 sps:$4 sm:$0xff]   ;;  %v1832_v14 = vld [vmem:[%s1986_s27 + $0x190] ss:$20 sps:$4 sm:$0xff]   ;;  %v1833_v15 = vld [vmem:[%s1986_s27 + $0x198] ss:$20 sps:$4 sm:$0xff]  }
  0x25   : > { %v1828_v12 = vld [vmem:[%s1986_s27 + $0x194] ss:$20 sps:$4 sm:$0xff]   ;;  %v1830_v13 = vld [vmem:[%s1986_s27 + $0x19c] ss:$20 sps:$4 sm:$0xff]   ;;  %v1836_v17 = vld [vmem:[%s1986_s27 + $0x1c4] ss:$20 sps:$4 sm:$0xff]  }
  0x26   : > { %1504 = vmatpush3.bf16.msra.mxu0 %v1758_v26  ;;  %v1834_v16 = vld [vmem:[%s1986_s27 + $0x1bc] ss:$20 sps:$4 sm:$0xff]   ;;  %v1838_v18 = vld [vmem:[%s1986_s27 + $0x1b8] ss:$20 sps:$4 sm:$0xff]   ;;  %v1839_v19 = vld [vmem:[%s1986_s27 + $0x1c0] ss:$20 sps:$4 sm:$0xff]  }
  0x27   : > { %1592 = vmatpush3.bf16.msra.mxu1 %v1759_v27  ;;  %1505 = vmatprep.subr.bf16.mxu0 %v1760_v28  ;;  %v1840_v20 = vld [vmem:[%s1986_s27 + $0x10] ss:$20 sps:$4 sm:$0xff]   ;;  %v1841_v21 = vld [vmem:[%s1986_s27 + $0x100] ss:$20 sps:$4 sm:$0xff]   ;;  %v1842_v22 = vld [vmem:[%s1986_s27 + $0x38] ss:$20 sps:$4 sm:$0xff]  }
  0x28   : > { %1593 = vmatprep.subr.bf16.mxu1 %v1761_v29  ;;  %v1843_v23 = vld [vmem:[%s1986_s27 + $0x128] ss:$20 sps:$4 sm:$0xff]   ;;  %v1844_v24 = vld [vmem:[%s1986_s27 + $0x60] ss:$20 sps:$4 sm:$0xff]   ;;  %v1845_v25 = vld [vmem:[%s1986_s27 + $0x150] ss:$20 sps:$4 sm:$0xff]  }
  0x29   : > { %v1846_v26 = vld [vmem:[%s1986_s27 + $0x88] ss:$20 sps:$4 sm:$0xff]   ;;  %v1847_v27 = vld [vmem:[%s1986_s27 + $0x178] ss:$20 sps:$4 sm:$0xff]   ;;  %v1848_v28 = vld [vmem:[%s1986_s27 + $0xb0] ss:$20 sps:$4 sm:$0xff]  }
  0x2a   : > { %1506 = vmatpush3.bf16.msra.mxu0 %v1762_v30  ;;  %v1849_v29 = vld [vmem:[%s1986_s27 + $0x1a0] ss:$20 sps:$4 sm:$0xff]   ;;  %v1850_v30 = vld [vmem:[%s1986_s27 + $0xd8] ss:$20 sps:$4 sm:$0xff]  }
  0x2b   : > { %1594 = vmatpush3.bf16.msra.mxu1 %v1763_v31  ;;  %1683 = vmatprep.subr.bf16.mxu0 %v1770_v36  ;;  %v1851_v31 = vld [vmem:[%s1986_s27 + $0x1c8] ss:$20 sps:$4 sm:$0xff]  }
  0x2c   : > { %1715 = vmatprep.subr.bf16.mxu1 %v1770_v36 }
  0x2d   : > { %915 = vmatmul.mubr.bf16.vlgmr.msra.gmra.mxu0 %v1764_v32 }
  0x2e   : > { %1044 = vmatmul.mubr.bf16.vlgmr.msra.gmra.mxu1 %v1767_v34  ;;  %1684 = vmatpush3.bf16.msra.mxu0 %v1770_v36  ;;  %v2081_v34 = vld [vmem:[%s2238_s2] ss:$0 sm:$0xff] }
  0x2f   : > { %1719 = vmatpush3.bf16.msra.mxu1 %v1770_v36  ;;  %922 = vmatprep.mubr.bf16.mxu0 %v1771_v37 }
  0x30   : > { %1051 = vmatprep.mubr.bf16.mxu1 %v1773_v38  ;;  %1685 = vmatprep.subr.bf16.mxu0 %v1789_v43 }
  0x31   : > { %1716 = vmatprep.subr.bf16.mxu1 %v1789_v43 }
  0x32   : > { %1686 = vmatpush3.bf16.msra.mxu0 %v1789_v43 }
  0x33   : > { %1720 = vmatpush3.bf16.msra.mxu1 %v1789_v43  ;;  %1687 = vmatprep.subr.bf16.mxu0 %v1808_v48 }
  0x34   : > { %1717 = vmatprep.subr.bf16.mxu1 %v1808_v48 }
  0x35   : > { %923 = vmatmul.mubr.bf16.gmra.mxu0 %v1775_v39 }
  0x36   : > { %1052 = vmatmul.mubr.bf16.gmra.mxu1 %v1776_v40  ;;  %930 = vmatprep.mubr.bf16.mxu0 %v1777_v41 }
  0x37   : > { %1059 = vmatprep.mubr.bf16.mxu1 %v1779_v42  ;;  %1688 = vmatpush3.bf16.msra.mxu0 %v1808_v48 }
  0x38   : > { %1721 = vmatpush3.bf16.msra.mxu1 %v1808_v48  ;;  %1689 = vmatprep.subr.bf16.mxu0 %v1827_v53 }
  0x39   : > { %1718 = vmatprep.subr.bf16.mxu1 %v1827_v53 }
  0x3b   : > { %1690 = vmatpush3.bf16.msra.mxu0 %v1827_v53 }
  0x3c   : > { %1722 = vmatpush3.bf16.msra.mxu1 %v1827_v53 }
  0x3d   : > { %931 = vmatmul.mubr.bf16.gmra.mxu0 %v1781_v44 }
  0x3e   : > { %1060 = vmatmul.mubr.bf16.gmra.mxu1 %v1782_v45  ;;  %938 = vmatprep.mubr.bf16.mxu0 %v1783_v46 }
  0x3f   : > { %1067 = vmatprep.mubr.bf16.mxu1 %v1785_v47 }
  0x45   : > { %939 = vmatmul.mubr.bf16.gmra.mxu0 %v1787_v49 }
  0x46   : > { %1068 = vmatmul.mubr.bf16.gmra.mxu1 %v1788_v50  ;;  %946 = vmatprep.mubr.bf16.mxu0 %v1790_v51 }
  0x47   : > { %1075 = vmatprep.mubr.bf16.mxu1 %v1792_v52 }
  0x4d   : > { %947 = vmatmul.mubr.bf16.gmra.mxu0 %v1794_v54 }
  0x4e   : > { %1076 = vmatmul.mubr.bf16.gmra.mxu1 %v1795_v55  ;;  %954 = vmatprep.mubr.bf16.mxu0 %v1796_v56 }
  0x4f   : > { %1083 = vmatprep.mubr.bf16.mxu1 %v1798_v57 }
  0x55   : > { %955 = vmatmul.mubr.bf16.gmra.mxu0 %v1800_v58 }
  0x56   : > { %1084 = vmatmul.mubr.bf16.gmra.mxu1 %v1801_v59  ;;  %962 = vmatprep.mubr.bf16.mxu0 %v1802_v60 }
  0x57   : > { %1091 = vmatprep.mubr.bf16.mxu1 %v1804_v61 }
  0x5d   : > { %963 = vmatmul.mubr.bf16.gmra.mxu0 %v1806_v62 }
  0x5e   : > { %1092 = vmatmul.mubr.bf16.gmra.mxu1 %v1807_v63  ;;  %970 = vmatprep.mubr.bf16.mxu0 %v1809_v0 }
  0x5f   : > { %1099 = vmatprep.mubr.bf16.mxu1 %v1811_v1 }
  0x65   : > { %971 = vmatmul.mubr.bf16.gmra.mxu0 %v1813_v2 }
  0x66   : > { %1100 = vmatmul.mubr.bf16.gmra.mxu1 %v1814_v3  ;;  %978 = vmatprep.mubr.bf16.mxu0 %v1815_v4 }
  0x67   : > { %1107 = vmatprep.mubr.bf16.mxu1 %v1817_v5 }
  0x6d   : > { %979 = vmatmul.mubr.bf16.gmra.mxu0 %v1819_v6 }
  0x6e   : > { %1108 = vmatmul.mubr.bf16.gmra.mxu1 %v1820_v7  ;;  %986 = vmatprep.mubr.bf16.mxu0 %v1821_v8 }
  0x6f   : > { %1115 = vmatprep.mubr.bf16.mxu1 %v1823_v9 }
  0x75   : > { %987 = vmatmul.mubr.bf16.gmra.mxu0 %v1825_v10 }
  0x76   : > { %1116 = vmatmul.mubr.bf16.gmra.mxu1 %v1826_v11  ;;  %994 = vmatprep.mubr.bf16.mxu0 %v1828_v12 }
  0x77   : > { %1123 = vmatprep.mubr.bf16.mxu1 %v1830_v13 }
  0x7d   : > { %995 = vmatmul.mubr.bf16.gmra.mxu0 %v1832_v14 }
  0x7e   : > { %1124 = vmatmul.mubr.bf16.gmra.mxu1 %v1833_v15  ;;  %1002 = vmatprep.mubr.bf16.mxu0 %v1834_v16 }
  0x7f   : > { %1131 = vmatprep.mubr.bf16.mxu1 %v1836_v17 }
  0x85   : > { %1003 = vmatmul.mubr.bf16.gmra.mxu0 %v1838_v18 }
  0x86   : > { %1132 = vmatmul.mubr.bf16.gmra.mxu1 %v1839_v19  ;;  %1691 = vmatprep.mubr.msk.bf16.mxu0 %vm845_vm0, %v1840_v20 }
  0x87   : > { %1703 = vmatprep.mubr.msk.bf16.mxu1 %vm845_vm0, %v1841_v21 }
  0x8d   : > { %1692 = vmatmul.mubr.msk.bf16.vlgmr.msra.gmra.mxu0 %vm845_vm0, %v1842_v22 }
  0x8e   : > { %1704 = vmatmul.mubr.msk.bf16.vlgmr.msra.gmra.mxu1 %vm845_vm0, %v1843_v23  ;;  %1695 = vmatprep.mubr.msk.bf16.mxu0 %vm845_vm0, %v1844_v24 }
  0x8f   : > { %1707 = vmatprep.mubr.msk.bf16.mxu1 %vm845_vm0, %v1845_v25 }
  0x95   : > { %1696 = vmatmul.mubr.msk.bf16.gmra.mxu0 %vm845_vm0, %v1846_v26 }
  0x96   : > { %1708 = vmatmul.mubr.msk.bf16.gmra.mxu1 %vm845_vm0, %v1847_v27  ;;  %1699 = vmatprep.mubr.msk.bf16.mxu0 %vm845_vm0, %v1848_v28 }
  0x97   : > { %1711 = vmatprep.mubr.msk.bf16.mxu1 %vm845_vm0, %v1849_v29 }
  0x9d   : > { %1700 = vmatmul.mubr.msk.bf16.gmra.mxu0 %vm845_vm0, %v1850_v30 }
  0x9e   : > { %1712 = vmatmul.mubr.msk.bf16.gmra.mxu1 %vm845_vm0, %v1851_v31 }
  0xed   : > { %v1507_v32 = vpop.f32.mrf.mxu0 }
  0xee   : > { %v1595_v33 = vpop.f32.mrf.mxu1 }
  0xef   : > { %v1508_v35 = vpop.f32.mrf.mxu0 }
  0xf0   : > { %v1509_v36 = vadd.f32 %v1508_v35, %v1507_v32  ;;  %v1596_v37 = vpop.f32.mrf.mxu1 }
  0xf1   : > { %v1597_v38 = vadd.f32 %v1596_v37, %v1595_v33  ;;  %v1510_v39 = vpop.f32.mrf.mxu0 }
  0xf2   : > { %v917_v40 = vadd.f32 %v1509_v36, %v2081_v34  ;;  %v1598_v41 = vpop.f32.mrf.mxu1 }
  0xf3   : > { %v1511_v42 = vpop.f32.mrf.mxu0 }
  0xf4   : > { %v1512_v43 = vadd.f32 %v1511_v42, %v1510_v39  ;;  %v1599_v44 = vpop.f32.mrf.mxu1  ;;  %v2084_v45 = vadd.f32 %v1597_v38, %v917_v40 }
  0xf5   : > { %v1600_v46 = vadd.f32 %v1599_v44, %v1598_v41  ;;  %v1513_v47 = vpop.f32.mrf.mxu0 }
  0xf6   : > { %v920_v48 = vadd.f32 %v1512_v43, %v2081_v34  ;;  %v1601_v49 = vpop.f32.mrf.mxu1 }
  0xf7   : > { %v1514_v50 = vpop.f32.mrf.mxu0 }
  0xf8   : > { %v1515_v51 = vadd.f32 %v1514_v50, %v1513_v47  ;;  %v1602_v52 = vpop.f32.mrf.mxu1  ;;  %v2087_v53 = vadd.f32 %v1600_v46, %v920_v48 }
  0xf9   : > { %v1603_v54 = vadd.f32 %v1602_v52, %v1601_v49  ;;  %v1516_v55 = vpop.f32.mrf.mxu0 }
  0xfa   : > { %v925_v56 = vadd.f32 %v1515_v51, %v2081_v34  ;;  %v1604_v57 = vpop.f32.mrf.mxu1 }
  0xfb   : > { %v1517_v58 = vpop.f32.mrf.mxu0 }
  0xfc   : > { %v1518_v59 = vadd.f32 %v1517_v58, %v1516_v55  ;;  %v1605_v60 = vpop.f32.mrf.mxu1  ;;  %v2090_v61 = vadd.f32 %v1603_v54, %v925_v56 }
  0xfd   : > { %v1606_v62 = vadd.f32 %v1605_v60, %v1604_v57  ;;  %v1519_v63 = vpop.f32.mrf.mxu0 }
  0xfe   : > { %v928_v0 = vadd.f32 %v1518_v59, %v2081_v34  ;;  %v1607_v1 = vpop.f32.mrf.mxu1 }
  0xff   : > { %v1520_v2 = vpop.f32.mrf.mxu0 }
 0x100   : > { %v1521_v3 = vadd.f32 %v1520_v2, %v1519_v63  ;;  %v1608_v4 = vpop.f32.mrf.mxu1  ;;  %v2093_v5 = vadd.f32 %v1606_v62, %v928_v0 }
 0x101   : > { %v1609_v6 = vadd.f32 %v1608_v4, %v1607_v1  ;;  %v1522_v7 = vpop.f32.mrf.mxu0 }
 0x102   : > { %v933_v8 = vadd.f32 %v1521_v3, %v2081_v34  ;;  %v1610_v9 = vpop.f32.mrf.mxu1 }
 0x103   : > { %v1523_v10 = vpop.f32.mrf.mxu0 }
 0x104   : > { %v1524_v11 = vadd.f32 %v1523_v10, %v1522_v7  ;;  %v1611_v12 = vpop.f32.mrf.mxu1  ;;  %v2096_v13 = vadd.f32 %v1609_v6, %v933_v8 }
 0x105   : > { %v1612_v14 = vadd.f32 %v1611_v12, %v1610_v9  ;;  %v1525_v15 = vpop.f32.mrf.mxu0 }
 0x106   : > { %v936_v16 = vadd.f32 %v1524_v11, %v2081_v34  ;;  %v1613_v17 = vpop.f32.mrf.mxu1 }
 0x107   : > { %v1526_v18 = vpop.f32.mrf.mxu0 }
 0x108   : > { %v1527_v19 = vadd.f32 %v1526_v18, %v1525_v15  ;;  %v1614_v20 = vpop.f32.mrf.mxu1  ;;  %v2099_v21 = vadd.f32 %v1612_v14, %v936_v16 }
 0x109   : > { %v1615_v22 = vadd.f32 %v1614_v20, %v1613_v17  ;;  %v1528_v23 = vpop.f32.mrf.mxu0 }
 0x10a   : > { %v941_v24 = vadd.f32 %v1527_v19, %v2081_v34  ;;  %v1616_v25 = vpop.f32.mrf.mxu1 }
 0x10b   : > { %v1529_v26 = vpop.f32.mrf.mxu0 }
 0x10c   : > { %v1530_v27 = vadd.f32 %v1529_v26, %v1528_v23  ;;  %v1617_v28 = vpop.f32.mrf.mxu1  ;;  %v2102_v29 = vadd.f32 %v1615_v22, %v941_v24 }
 0x10d   : > { %v1618_v30 = vadd.f32 %v1617_v28, %v1616_v25  ;;  %v1531_v31 = vpop.f32.mrf.mxu0 }
 0x10e   : > { %v944_v32 = vadd.f32 %v1530_v27, %v2081_v34  ;;  %v1619_v33 = vpop.f32.mrf.mxu1 }
 0x10f   : > { %v1532_v35 = vpop.f32.mrf.mxu0 }
 0x110   : > { %v1533_v36 = vadd.f32 %v1532_v35, %v1531_v31  ;;  %v1620_v37 = vpop.f32.mrf.mxu1  ;;  %v2105_v38 = vadd.f32 %v1618_v30, %v944_v32 }
 0x111   : > { %v1621_v39 = vadd.f32 %v1620_v37, %v1619_v33  ;;  %v1534_v40 = vpop.f32.mrf.mxu0 }
 0x112   : > { %v949_v41 = vadd.f32 %v1533_v36, %v2081_v34  ;;  %v1622_v42 = vpop.f32.mrf.mxu1 }
 0x113   : > { %v1535_v43 = vpop.f32.mrf.mxu0 }
 0x114   : > { %v1536_v44 = vadd.f32 %v1535_v43, %v1534_v40  ;;  %v1623_v46 = vpop.f32.mrf.mxu1  ;;  %v2108_v47 = vadd.f32 %v1621_v39, %v949_v41 }
 0x115   : > { %v1624_v48 = vadd.f32 %v1623_v46, %v1622_v42  ;;  %v1537_v49 = vpop.f32.mrf.mxu0 }
 0x116   : > { %2240 = vst [vmem:[#allocation2_spill] sm:$0xff] %v2108_v47  ;;  %v952_v50 = vadd.f32 %v1536_v44, %v2081_v34  ;;  %v1625_v51 = vpop.f32.mrf.mxu1 }
 0x117   : > { %v1538_v52 = vpop.f32.mrf.mxu0 }
 0x118   : > { %v1539_v54 = vadd.f32 %v1538_v52, %v1537_v49  ;;  %v1626_v55 = vpop.f32.mrf.mxu1  ;;  %v2111_v56 = vadd.f32 %v1624_v48, %v952_v50 }
 0x119   : > { %v1627_v57 = vadd.f32 %v1626_v55, %v1625_v51  ;;  %v1540_v58 = vpop.f32.mrf.mxu0 }
 0x11a   : > { %2241 = vst [vmem:[#allocation3_spill] sm:$0xff] %v2111_v56  ;;  %v957_v59 = vadd.f32 %v1539_v54, %v2081_v34  ;;  %v1628_v60 = vpop.f32.mrf.mxu1 }
 0x11b   : > { %v1541_v62 = vpop.f32.mrf.mxu0 }
 0x11c   : > { %v1542_v63 = vadd.f32 %v1541_v62, %v1540_v58  ;;  %v1629_v0 = vpop.f32.mrf.mxu1  ;;  %v2114_v1 = vadd.f32 %v1627_v57, %v957_v59 }
 0x11d   : > { %v1630_v2 = vadd.f32 %v1629_v0, %v1628_v60  ;;  %v1543_v3 = vpop.f32.mrf.mxu0 }
 0x11e   : > { %v960_v4 = vadd.f32 %v1542_v63, %v2081_v34  ;;  %v1631_v6 = vpop.f32.mrf.mxu1 }
 0x11f   : > { %v1544_v7 = vpop.f32.mrf.mxu0 }
 0x120   : > { %v1632_v8 = vpop.f32.mrf.mxu1  ;;  %v2117_v9 = vadd.f32 %v1630_v2, %v960_v4  ;;  %v1545_v57 = vadd.f32 %v1544_v7, %v1543_v3 }
 0x121   : > { %v1546_v10 = vpop.f32.mrf.mxu0 }
 0x122   : > { %2242 = vst [vmem:[#allocation4_spill] sm:$0xff] %v2117_v9  ;;  %v1634_v11 = vpop.f32.mrf.mxu1  ;;  %v965_v2 = vadd.f32 %v1545_v57, %v2081_v34 }
 0x123   : > { %v1547_v12 = vpop.f32.mrf.mxu0 }
 0x124   : > { %v1635_v14 = vpop.f32.mrf.mxu1  ;;  %v1548_v4 = vadd.f32 %v1547_v12, %v1546_v10 }
 0x125   : > { %v1549_v15 = vpop.f32.mrf.mxu0  ;;  %v1636_v12 = vadd.f32 %v1635_v14, %v1634_v11 }
 0x126   : > { %v1637_v16 = vpop.f32.mrf.mxu1 }
 0x127   : > { %v1550_v17 = vpop.f32.mrf.mxu0 }
 0x128   : > { %v1638_v18 = vpop.f32.mrf.mxu1  ;;  %v1551_v54 = vadd.f32 %v1550_v17, %v1549_v15  ;;  %v1633_v17 = vadd.f32 %v1632_v8, %v1631_v6 }
 0x129   : > { %v1552_v19 = vpop.f32.mrf.mxu0  ;;  %v1639_v9 = vadd.f32 %v1638_v18, %v1637_v16 }
 0x12a   : > { %v1640_v20 = vpop.f32.mrf.mxu1  ;;  %v973_v62 = vadd.f32 %v1551_v54, %v2081_v34  ;;  %v1094_v10 = vadd.f32 %v1633_v17, %v965_v2 }
 0x12b   : > { %v1553_v22 = vpop.f32.mrf.mxu0 }
 0x12c   : > { %v1641_v23 = vpop.f32.mrf.mxu1  ;;  %v1554_v63 = vadd.f32 %v1553_v22, %v1552_v19  ;;  %v1102_v54 = vadd.f32 %v1639_v9, %v973_v62  ;;  %v968_v19 = vadd.f32 %v1548_v4, %v2081_v34 }
 0x12d   : > { %v1555_v24 = vpop.f32.mrf.mxu0  ;;  %v1642_v47 = vadd.f32 %v1641_v23, %v1640_v20 }
 0x12e   : > { %v2119_v25 = vpop.f32.mrf.mxu1  ;;  %v976_v7 = vadd.f32 %v1554_v63, %v2081_v34 }
 0x12f   : > { %v1556_v26 = vpop.f32.mrf.mxu0 }
 0x130   : > { %v1644_v27 = vpop.f32.mrf.mxu1  ;;  %v1557_v16 = vadd.f32 %v1556_v26, %v1555_v24  ;;  %v1105_v23 = vadd.f32 %v1642_v47, %v976_v7 }
 0x131   : > { %v1558_v28 = vpop.f32.mrf.mxu0  ;;  %v1645_v24 = vadd.f32 %v1644_v27, %v2119_v25 }
 0x132   : > { %v2121_v30 = vpop.f32.mrf.mxu1 }
 0x133   : > { %v1559_v31 = vpop.f32.mrf.mxu0 }
 0x134   : > { %v2123_v32 = vpop.f32.mrf.mxu1  ;;  %v1560_v18 = vadd.f32 %v1559_v31, %v1558_v28  ;;  %v1097_v31 = vadd.f32 %v1636_v12, %v968_v19 }
 0x135   : > { %v1561_v33 = vpop.f32.mrf.mxu0 }
 0x136   : > { %v2125_v35 = vpop.f32.mrf.mxu1  ;;  %v984_v47 = vadd.f32 %v1560_v18, %v2081_v34 }
 0x137   : > { %v1562_v36 = vpop.f32.mrf.mxu0 }
 0x138   : > { %v1650_v37 = vpop.f32.mrf.mxu1 }
 0x139   : > { %v1564_v39 = vpop.f32.mrf.mxu0 }
 0x13a   : > { %v2127_v40 = vpop.f32.mrf.mxu1 }
 0x13b   : > { %v1565_v41 = vpop.f32.mrf.mxu0 }
 0x13c   : > { %v2129_v42 = vpop.f32.mrf.mxu1 }
 0x13d   : > { %v2131_v43 = vpop.f32.mrf.mxu0 }
 0x13e   : > { %v2133_v44 = vpop.f32.mrf.mxu1 }
 0x13f   : > { %v2135_v46 = vpop.f32.mrf.mxu0 }
 0x140   : > { %v2137_v48 = vpop.f32.mrf.mxu1  ;;  %v1569_v19 = vadd.f32 %v2135_v46, %v2131_v43 }
 0x141   : > { %v2139_v49 = vpop.f32.mrf.mxu0 }
 0x142   : > { %v2141_v50 = vpop.f32.mrf.mxu1 }
 0x143   : > { %2243 = vst [vmem:[#allocation5_spill] sm:$0xff] %v2141_v50  ;;  %v2143_v51 = vpop.f32.mrf.mxu0 }
 0x144   : > { %v2145_v52 = vpop.f32.mrf.mxu1 }
 0x145   : > { %2244 = vst [vmem:[#allocation6_spill] sm:$0xff] %v2145_v52  ;;  %v1573_v55 = vpop.f32.mrf.mxu0  ;;  %v1563_v52 = vadd.f32 %v1562_v36, %v1561_v33  ;;  %v1566_v33 = vadd.f32 %v1565_v41, %v1564_v39  ;;  %v981_v39 = vadd.f32 %v1557_v16, %v2081_v34  ;;  %v1648_v16 = vadd.f32 %v2123_v32, %v2121_v30 }
 0x146   : > { %v2147_v58 = vpop.f32.mrf.mxu1 }
 0x147   : > { %v1574_v59 = vpop.f32.mrf.mxu0  ;;  %v992_v25 = vadd.f32 %v1566_v33, %v2081_v34  ;;  %v1110_v12 = vadd.f32 %v1645_v24, %v981_v39 }
 0x148   : > { %v2149_v60 = vpop.f32.mrf.mxu1  ;;  %v1575_v4 = vadd.f32 %v1574_v59, %v1573_v55 }
 0x149   : > { %v2152_v0 = vpop.f32.mrf.mxu0 }
 0x14a   : > { %v2155_v56 = vpop.f32.mrf.mxu1 }
 0x14b   : > { %v2157_v15 = vpop.f32.mrf.mxu0 }
 0x14c   : > { %v2159_v3 = vpop.f32.mrf.mxu1 }
 0x14d   : > { %v1693_v50 = vpop.f32.mrf.mxu0 }
 0x14e   : > { %v1183_v22 = vadd.f32 %v1693_v50, %v2090_v61  ;;  %v1705_v57 = vpop.f32.mrf.mxu1  ;;  %v989_v50 = vadd.f32 %v1563_v52, %v2081_v34 }
 0x14f   : > { %v1231_v6 = vadd.f32 %v1705_v57, %v1102_v54  ;;  %v1174_v8 = vpop.f32.mrf.mxu0  ;;  %v1654_v54 = vadd.f32 %v2129_v42, %v2127_v40 }
 0x150   : > { %v1271_v9 = vmax.f32 %v1183_v22, 0.0  ;;  %v1175_v36 = vadd.f32 %v1174_v8, %v2084_v45  ;;  %v1222_v61 = vpop.f32.mrf.mxu1  ;;  %v1651_v45 = vadd.f32 %v1650_v37, %v2125_v35 }
 0x151   : > { %v1283_v11 = vmax.f32 %v1231_v6, 0.0  ;;  %v1223_v14 = vadd.f32 %v1222_v61, %v1094_v10  ;;  %v1694_v20 = vpop.f32.mrf.mxu0  ;;  %v1121_v46 = vadd.f32 %v1654_v54, %v992_v25  ;;  %v1005_v6 = vadd.f32 %v1575_v4, %v2081_v34  ;;  %v2246_v25 = vld [vmem:[#allocation5_spill] sm:$0xff]  ;;  %v2248_v4 = vld [vmem:[#allocation4_spill] sm:$0xff] }
 0x152   : > { %1295 = vst [vmem:[%s2168_s21 + $0x10] sm:$0xff] %v1271_v9  ;;  %v1269_v26 = vmax.f32 %v1175_v36, 0.0  ;;  %v1186_v62 = vadd.f32 %v1694_v20, %v2093_v5  ;;  %v1706_v28 = vpop.f32.mrf.mxu1  ;;  %v1118_v7 = vadd.f32 %v1651_v45, %v989_v50  ;;  %v997_v9 = vadd.f32 %v1569_v19, %v2081_v34 }
 0x153   : > { %1307 = vst [vmem:[%s2168_s21 + $0x70] sm:$0xff] %v1283_v11  ;;  %v1281_v41 = vmax.f32 %v1223_v14, 0.0  ;;  %v1234_v52 = vadd.f32 %v1706_v28, %v1105_v23  ;;  %v1177_v63 = vpop.f32.mrf.mxu0  ;;  %v1113_v36 = vadd.f32 %v1648_v16, %v984_v47  ;;  %v1572_v61 = vadd.f32 %v2143_v51, %v2139_v49 }
 0x154   : > { %1293 = vst [vmem:[%s2168_s21] sm:$0xff] %v1269_v26  ;;  %v1272_v27 = vmax.f32 %v1186_v62, 0.0  ;;  %v1178_v5 = vadd.f32 %v1177_v63, %v2087_v53  ;;  %v1225_v2 = vpop.f32.mrf.mxu1  ;;  %v1657_v14 = vadd.f32 %v2137_v48, %v2133_v44 }
 0x155   : > { %1305 = vst [vmem:[%s2168_s21 + $0x60] sm:$0xff] %v1281_v41  ;;  %v1284_v17 = vmax.f32 %v1234_v52, 0.0  ;;  %v1226_v35 = vadd.f32 %v1225_v2, %v1097_v31  ;;  %v1697_v37 = vpop.f32.mrf.mxu0  ;;  %v1000_v28 = vadd.f32 %v1572_v61, %v2081_v34  ;;  %v2245_v52 = vld [vmem:[#allocation2_spill] sm:$0xff] }
 0x156   : > { %1296 = vst [vmem:[%s2168_s21 + $0x18] sm:$0xff] %v1272_v27  ;;  %v1270_v22 = vmax.f32 %v1178_v5, 0.0  ;;  %v1199_v57 = vadd.f32 %v1697_v37, %v2102_v29  ;;  %v1709_v53 = vpop.f32.mrf.mxu1  ;;  %v1578_v29 = vadd.f32 %v2157_v15, %v2152_v0  ;;  %v1663_v0 = vadd.f32 %v2149_v60, %v2147_v58 }
 0x157   : > { %1308 = vst [vmem:[%s2168_s21 + $0x78] sm:$0xff] %v1284_v17  ;;  %v1282_v55 = vmax.f32 %v1226_v35, 0.0  ;;  %v1247_v59 = vadd.f32 %v1709_v53, %v1118_v7  ;;  %v1190_v10 = vpop.f32.mrf.mxu0  ;;  %v1126_v48 = vadd.f32 %v1657_v14, %v997_v9 }
 0x158   : > { %1294 = vst [vmem:[%s2168_s21 + $0x8] sm:$0xff] %v1270_v22  ;;  %v1275_v40 = vmax.f32 %v1199_v57, 0.0  ;;  %v1191_v42 = vadd.f32 %v1190_v10, %v2096_v13  ;;  %v1238_v43 = vpop.f32.mrf.mxu1  ;;  %v1008_v24 = vadd.f32 %v1578_v29, %v2081_v34  ;;  %v1134_v60 = vadd.f32 %v1663_v0, %v1005_v6  ;;  %v2249_v57 = vld [vmem:[#allocation3_spill] sm:$0xff] }
 0x159   : > { %1306 = vst [vmem:[%s2168_s21 + $0x68] sm:$0xff] %v1282_v55  ;;  %v1287_v8 = vmax.f32 %v1247_v59, 0.0  ;;  %v1239_v18 = vadd.f32 %v1238_v43, %v1110_v12  ;;  %v1698_v33 = vpop.f32.mrf.mxu0 }
 0x15a   : > { %1299 = vst [vmem:[%s2168_s21 + $0x30] sm:$0xff] %v1275_v40  ;;  %v1273_v30 = vmax.f32 %v1191_v42, 0.0  ;;  %v1202_v13 = vadd.f32 %v1698_v33, %v2105_v38  ;;  %v1710_v32 = vpop.f32.mrf.mxu1 }
 0x15b   : > { %1311 = vst [vmem:[%s2168_s21 + $0x90] sm:$0xff] %v1287_v8  ;;  %v1285_v15 = vmax.f32 %v1239_v18, 0.0  ;;  %v1250_v50 = vadd.f32 %v1710_v32, %v1121_v46  ;;  %v1193_v11 = vpop.f32.mrf.mxu0 }
 0x15c   : > { %1297 = vst [vmem:[%s2168_s21 + $0x20] sm:$0xff] %v1273_v30  ;;  %v1276_v20 = vmax.f32 %v1202_v13, 0.0  ;;  %v1194_v38 = vadd.f32 %v1193_v11, %v2099_v21  ;;  %v1241_v23 = vpop.f32.mrf.mxu1  ;;  %v1666_v21 = vadd.f32 %v2159_v3, %v2155_v56 }
 0x15d   : > { %1309 = vst [vmem:[%s2168_s21 + $0x80] sm:$0xff] %v1285_v15  ;;  %v1288_v49 = vmax.f32 %v1250_v50, 0.0  ;;  %v1242_v51 = vadd.f32 %v1241_v23, %v1113_v36  ;;  %v1701_v58 = vpop.f32.mrf.mxu0 }
 0x15e   : > { %1300 = vst [vmem:[%s2168_s21 + $0x38] sm:$0xff] %v1276_v20  ;;  %v1274_v26 = vmax.f32 %v1194_v38, 0.0  ;;  %v1215_v62 = vadd.f32 %v1701_v58, %v2114_v1  ;;  %v1713_v44 = vpop.f32.mrf.mxu1  ;;  %v2247_v1 = vld [vmem:[#allocation6_spill] sm:$0xff]  ;;  %v1137_v56 = vadd.f32 %v1666_v21, %v1008_v24 }
 0x15f   : > { %1312 = vst [vmem:[%s2168_s21 + $0x98] sm:$0xff] %v1288_v49  ;;  %v1286_v31 = vmax.f32 %v1242_v51, 0.0  ;;  %v1263_v39 = vadd.f32 %v1713_v44, %v1134_v60  ;;  %v1206_v45 = vpop.f32.mrf.mxu0  ;;  %v1660_v27 = vadd.f32 %v2247_v1, %v2246_v25 }
 0x160   : > { %1298 = vst [vmem:[%s2168_s21 + $0x28] sm:$0xff] %v1274_v26  ;;  %v1279_v41 = vmax.f32 %v1215_v62, 0.0  ;;  %v1207_v63 = vadd.f32 %v1206_v45, %v2245_v52  ;;  %v1254_v47 = vpop.f32.mrf.mxu1 }
 0x161   : > { %1310 = vst [vmem:[%s2168_s21 + $0x88] sm:$0xff] %v1286_v31  ;;  %v1291_v34 = vmax.f32 %v1263_v39, 0.0  ;;  %v1255_v5 = vadd.f32 %v1254_v47, %v1126_v48  ;;  %v1702_v2 = vpop.f32.mrf.mxu0  ;;  %v1129_v19 = vadd.f32 %v1660_v27, %v1000_v28 }
 0x162   : > { %1303 = vst [vmem:[%s2168_s21 + $0x50] sm:$0xff] %v1279_v41  ;;  %v1277_v3 = vmax.f32 %v1207_v63, 0.0  ;;  %v1218_v17 = vadd.f32 %v1702_v2, %v2248_v4  ;;  %v1714_v35 = vpop.f32.mrf.mxu1 }
 0x163   : > { %1315 = vst [vmem:[%s2168_s21 + $0xb0] sm:$0xff] %v1291_v34  ;;  %v1289_v37 = vmax.f32 %v1255_v5, 0.0  ;;  %v1266_v7 = vadd.f32 %v1714_v35, %v1137_v56  ;;  %v1209_v54 = vpop.f32.mrf.mxu0 }
 0x164   : > { %1301 = vst [vmem:[%s2168_s21 + $0x40] sm:$0xff] %v1277_v3  ;;  %v1280_v22 = vmax.f32 %v1218_v17, 0.0  ;;  %v1210_v53 = vadd.f32 %v1209_v54, %v2249_v57  ;;  %v1257_v55 = vpop.f32.mrf.mxu1 }
 0x165   : > { %1313 = vst [vmem:[%s2168_s21 + $0xa0] sm:$0xff] %v1289_v37  ;;  %v1292_v59 = vmax.f32 %v1266_v7, 0.0  ;;  %v1258_v10 = vadd.f32 %v1257_v55, %v1129_v19 }
 0x166   : > { %1304 = vst [vmem:[%s2168_s21 + $0x58] sm:$0xff] %v1280_v22  ;;  %v1278_v12 = vmax.f32 %v1210_v53, 0.0 }
 0x167   : > { %1316 = vst [vmem:[%s2168_s21 + $0xb8] sm:$0xff] %v1292_v59  ;;  %v1290_v16 = vmax.f32 %v1258_v10, 0.0 }
 0x168   : > { %1302 = vst [vmem:[%s2168_s21 + $0x48] sm:$0xff] %v1278_v12 }
 0x169   : > { %1314 = vst [vmem:[%s2168_s21 + $0xa8] sm:$0xff] %v1290_v16 }
 0x16a PF: > { %s13_s12 = sadd.s32 1, %s1858_s12  }
 0x16b   : > { %p10_p4 = scmp.ge.s32.totalorder %s13_s12, 4  }
 0x16d   :  { %12 = sbr.rel (!%p10_p4) target bundleno = 1 (0x1), region = 62 }

// kernel: simplenet_forward.5
= control target key start
LH: loop header
LB: loop body
LE: loop exit
PB: predicated region body
PF: predicated region fallthrough
CT: control target
= control target key end

     0   :  { %v817_v34 = vmov 0.0   ;;  %vm818_vm0 = vmmov 0   ;;  %vm403_vm1 = vcmask 523264   ;;  %s1013_s1 = inlined_call_operand.vmem [shape: bf16[576,128], index: 1, kind: input, shape index: {}]   ;;  %s1014_s0 = inlined_call_operand.vmem [shape: bf16[48,576], index: 0, kind: input, shape index: {}]   ;;  %s1015_s2 = inlined_call_operand.vmem [shape: f32[1,128], index: 2, kind: input, shape index: {}]   ;;  %s1016_s3 = inlined_call_operand.vmem [shape: f32[48,128], index: 3, kind: output, shape index: {}]  }
   0x1   :  { %v760_v0 = vld [vmem:[%s1013_s1 + $0x78] sm:$0xff]   ;;  %v764_v4 = vld [vmem:[%s1013_s1 + $0x70] sm:$0xff]   ;;  %v768_v8 = vld [vmem:[%s1013_s1 + $0x68] sm:$0xff]  }
   0x2   :  { %v761_v1 = vld [vmem:[%s1013_s1 + $0xf8] sm:$0xff]   ;;  %655 = vmatprep.subr.bf16.mxu0 %v760_v0  ;;  %v765_v5 = vld [vmem:[%s1013_s1 + $0xf0] sm:$0xff]   ;;  %v769_v9 = vld [vmem:[%s1013_s1 + $0xe8] sm:$0xff]  }
   0x3   :  { %v762_v2 = vld [vmem:[%s1013_s1 + $0x38] sm:$0xff]   ;;  %689 = vmatprep.subr.bf16.mxu1 %v761_v1  ;;  %v766_v6 = vld [vmem:[%s1013_s1 + $0x30] sm:$0xff]   ;;  %v770_v10 = vld [vmem:[%s1013_s1 + $0x28] sm:$0xff]  }
   0x4   :  { %v763_v3 = vld [vmem:[%s1013_s1 + $0xb8] sm:$0xff]   ;;  %656 = vmatpush3.bf16.msra.mxu0 %v762_v2  ;;  %v767_v7 = vld [vmem:[%s1013_s1 + $0xb0] sm:$0xff]   ;;  %v771_v11 = vld [vmem:[%s1013_s1 + $0xa8] sm:$0xff]  }
   0x5   :  { %690 = vmatpush3.bf16.msra.mxu1 %v763_v3  ;;  %657 = vmatprep.subr.bf16.mxu0 %v764_v4  ;;  %v772_v12 = vld [vmem:[%s1013_s1 + $0x60] sm:$0xff]   ;;  %v776_v16 = vld [vmem:[%s1013_s1 + $0x58] sm:$0xff]   ;;  %v780_v20 = vld [vmem:[%s1013_s1 + $0x50] sm:$0xff]  }
   0x6   :  { %691 = vmatprep.subr.bf16.mxu1 %v765_v5  ;;  %v773_v13 = vld [vmem:[%s1013_s1 + $0xe0] sm:$0xff]   ;;  %v777_v17 = vld [vmem:[%s1013_s1 + $0xd8] sm:$0xff]   ;;  %v781_v21 = vld [vmem:[%s1013_s1 + $0xd0] sm:$0xff]  }
   0x7   :  { %v774_v14 = vld [vmem:[%s1013_s1 + $0x20] sm:$0xff]   ;;  %v778_v18 = vld [vmem:[%s1013_s1 + $0x18] sm:$0xff]   ;;  %v782_v22 = vld [vmem:[%s1013_s1 + $0x10] sm:$0xff]  }
   0x8   :  { %658 = vmatpush3.bf16.msra.mxu0 %v766_v6  ;;  %v775_v15 = vld [vmem:[%s1013_s1 + $0xa0] sm:$0xff]   ;;  %v779_v19 = vld [vmem:[%s1013_s1 + $0x98] sm:$0xff]   ;;  %v783_v23 = vld [vmem:[%s1013_s1 + $0x90] sm:$0xff]  }
   0x9   :  { %692 = vmatpush3.bf16.msra.mxu1 %v767_v7  ;;  %659 = vmatprep.subr.bf16.mxu0 %v768_v8  ;;  %v784_v24 = vld [vmem:[%s1013_s1 + $0x48] sm:$0xff]   ;;  %v788_v28 = vld [vmem:[%s1013_s1 + $0x40] sm:$0xff]   ;;  %v798_v37 = vld [vmem:[%s1013_s1 + $0x118] sm:$0xff]  }
   0xa   :  { %693 = vmatprep.subr.bf16.mxu1 %v769_v9  ;;  %v785_v25 = vld [vmem:[%s1013_s1 + $0xc8] sm:$0xff]   ;;  %v789_v29 = vld [vmem:[%s1013_s1 + $0xc0] sm:$0xff]   ;;  %v803_v40 = vld [vmem:[%s1013_s1 + $0x110] sm:$0xff]  }
   0xb   :  { %v786_v26 = vld [vmem:[%s1013_s1 + $0x8] sm:$0xff]   ;;  %v790_v30 = vld [vmem:[%s1013_s1] sm:$0xff]   ;;  %v809_v45 = vld [vmem:[%s1014_s0 + $0x5c] ss:$20 sps:$4 sm:$0xff]  }
   0xc   :  { %660 = vmatpush3.bf16.msra.mxu0 %v770_v10  ;;  %v787_v27 = vld [vmem:[%s1013_s1 + $0x88] sm:$0xff]   ;;  %v791_v31 = vld [vmem:[%s1013_s1 + $0x80] sm:$0xff]  }
   0xd   :  { %694 = vmatpush3.bf16.msra.mxu1 %v771_v11  ;;  %661 = vmatprep.subr.bf16.mxu0 %v772_v12  ;;  %v792_v32 = vld [vmem:[%s1014_s0] ss:$20 sps:$4 sm:$0xff]   ;;  %v794_v33 = vld [vmem:[%s1014_s0 + $0x4] ss:$20 sps:$4 sm:$0xff]   ;;  %v795_v35 = vld [vmem:[%s1014_s0 + $0x8] ss:$20 sps:$4 sm:$0xff]  }
   0xe   :  { %695 = vmatprep.subr.bf16.mxu1 %v773_v13  ;;  %v797_v36 = vld [vmem:[%s1014_s0 + $0xc] ss:$20 sps:$4 sm:$0xff]   ;;  %445 = vmatprep.mubr.bf16.mxu0 %v794_v33  ;;  %v801_v39 = vld [vmem:[%s1014_s0 + $0x34] ss:$20 sps:$4 sm:$0xff]   ;;  %v805_v42 = vld [vmem:[%s1014_s0 + $0x30] ss:$20 sps:$4 sm:$0xff]  }
   0xf   :  { %502 = vmatprep.mubr.bf16.mxu1 %v797_v36  ;;  %v799_v38 = vld [vmem:[%s1014_s0 + $0x2c] ss:$20 sps:$4 sm:$0xff]   ;;  %v804_v41 = vld [vmem:[%s1014_s0 + $0x28] ss:$20 sps:$4 sm:$0xff]   ;;  %v811_v47 = vld [vmem:[%s1014_s0 + $0x50] ss:$20 sps:$4 sm:$0xff]  }
  0x10   :  { %662 = vmatpush3.bf16.msra.mxu0 %v774_v14  ;;  %v807_v43 = vld [vmem:[%s1014_s0 + $0x54] ss:$20 sps:$4 sm:$0xff]   ;;  %v813_v46 = vld [vmem:[%s1013_s1 + $0x100] sm:$0xff]   ;;  %v812_v48 = vld [vmem:[%s1014_s0 + $0x58] ss:$20 sps:$4 sm:$0xff]  }
  0x11   :  { %696 = vmatpush3.bf16.msra.mxu1 %v775_v15  ;;  %663 = vmatprep.subr.bf16.mxu0 %v776_v16  ;;  %v806_v44 = vld [vmem:[%s1013_s1 + $0x108] sm:$0xff]   ;;  %v814_v49 = vld [vmem:[%s1014_s0 + $0x10] ss:$20 sps:$4 sm:$0xff]   ;;  %v816_v51 = vld [vmem:[%s1014_s0 + $0x60] ss:$20 sps:$4 sm:$0xff]  }
  0x12   :  { %697 = vmatprep.subr.bf16.mxu1 %v777_v17  ;;  %v815_v50 = vld [vmem:[%s1014_s0 + $0x38] ss:$20 sps:$4 sm:$0xff]   ;;  %v600_v5 = vld [vmem:[%s1015_s2] ss:$0 sm:$0xff] }
  0x14   :  { %664 = vmatpush3.bf16.msra.mxu0 %v778_v18 }
  0x15   :  { %698 = vmatpush3.bf16.msra.mxu1 %v779_v19  ;;  %665 = vmatprep.subr.bf16.mxu0 %v780_v20 }
  0x16   :  { %699 = vmatprep.subr.bf16.mxu1 %v781_v21 }
  0x18   :  { %666 = vmatpush3.bf16.msra.mxu0 %v782_v22 }
  0x19   :  { %700 = vmatpush3.bf16.msra.mxu1 %v783_v23  ;;  %667 = vmatprep.subr.bf16.mxu0 %v784_v24 }
  0x1a   :  { %701 = vmatprep.subr.bf16.mxu1 %v785_v25 }
  0x1c   :  { %668 = vmatpush3.bf16.msra.mxu0 %v786_v26 }
  0x1d   :  { %702 = vmatpush3.bf16.msra.mxu1 %v787_v27  ;;  %669 = vmatprep.subr.bf16.mxu0 %v788_v28 }
  0x1e   :  { %703 = vmatprep.subr.bf16.mxu1 %v789_v29 }
  0x20   :  { %670 = vmatpush3.bf16.msra.mxu0 %v790_v30 }
  0x21   :  { %704 = vmatpush3.bf16.msra.mxu1 %v791_v31  ;;  %730 = vmatprep.subr.bf16.mxu0 %v817_v34 }
  0x22   :  { %750 = vmatprep.subr.bf16.mxu1 %v817_v34 }
  0x23   :  { %446 = vmatmul.mubr.bf16.vlgmr.msra.gmra.mxu0 %v792_v32 }
  0x24   :  { %503 = vmatmul.mubr.bf16.vlgmr.msra.gmra.mxu1 %v795_v35  ;;  %731 = vmatpush3.bf16.msra.mxu0 %v798_v37 }
  0x25   :  { %754 = vmatpush3.bf16.msra.mxu1 %v798_v37  ;;  %453 = vmatprep.mubr.bf16.mxu0 %v799_v38 }
  0x26   :  { %751 = vmatprep.subr.bf16.mxu1 %v817_v34  ;;  %510 = vmatprep.mubr.bf16.mxu1 %v801_v39 }
  0x27   :  { %732 = vmatprep.subr.bf16.mxu0 %v817_v34 }
  0x28   :  { %733 = vmatpush3.bf16.msra.mxu0 %v803_v40 }
  0x29   :  { %755 = vmatpush3.bf16.msra.mxu1 %v803_v40  ;;  %734 = vmatprep.subr.bf16.mxu0 %v817_v34 }
  0x2a   :  { %752 = vmatprep.subr.bf16.mxu1 %v817_v34 }
  0x2b   :  { %454 = vmatmul.mubr.bf16.gmra.mxu0 %v804_v41 }
  0x2c   :  { %511 = vmatmul.mubr.bf16.gmra.mxu1 %v805_v42  ;;  %461 = vmatprep.mubr.bf16.mxu0 %v807_v43 }
  0x2d   :  { %756 = vmatpush3.bf16.msra.mxu1 %v806_v44  ;;  %518 = vmatprep.mubr.bf16.mxu1 %v809_v45 }
  0x2e   :  { %735 = vmatpush3.bf16.msra.mxu0 %v806_v44  ;;  %753 = vmatprep.subr.bf16.mxu1 %v817_v34 }
  0x2f   :  { %736 = vmatprep.subr.bf16.mxu0 %v817_v34 }
  0x31   :  { %757 = vmatpush3.bf16.msra.mxu1 %v813_v46 }
  0x32   :  { %737 = vmatpush3.bf16.msra.mxu0 %v813_v46 }
  0x33   :  { %462 = vmatmul.mubr.bf16.gmra.mxu0 %v811_v47 }
  0x34   :  { %519 = vmatmul.mubr.bf16.gmra.mxu1 %v812_v48  ;;  %738 = vmatprep.mubr.msk.bf16.mxu0 %vm818_vm0, %v817_v34 }
  0x35   :  { %742 = vmatprep.mubr.msk.bf16.mxu1 %vm818_vm0, %v817_v34 }
  0x3b   :  { %739 = vmatmul.mubr.msk.bf16.vlgmr.msra.gmra.mxu0 %vm403_vm1, %v814_v49 }
  0x3c   :  { %743 = vmatmul.mubr.msk.bf16.vlgmr.msra.gmra.mxu1 %vm403_vm1, %v815_v50 }
  0x3d   :  { %746 = vmatprep.mubr.msk.bf16.mxu1 %vm818_vm0, %v817_v34 }
  0x44   :  { %747 = vmatmul.mubr.msk.bf16.gmra.mxu1 %vm403_vm1, %v816_v51 }
  0xe3   :  { %v671_v52 = vpop.f32.mrf.mxu0 }
  0xe4   :  { %v705_v53 = vpop.f32.mrf.mxu1 }
  0xe5   :  { %v672_v54 = vpop.f32.mrf.mxu0 }
  0xe6   :  { %v706_v55 = vpop.f32.mrf.mxu1  ;;  %v673_v3 = vadd.f32 %v672_v54, %v671_v52 }
  0xe7   :  { %v674_v56 = vpop.f32.mrf.mxu0  ;;  %v707_v16 = vadd.f32 %v706_v55, %v705_v53 }
  0xe8   :  { %v708_v57 = vpop.f32.mrf.mxu1  ;;  %v448_v10 = vadd.f32 %v673_v3, %v600_v5 }
  0xe9   :  { %v675_v58 = vpop.f32.mrf.mxu0 }
  0xea   :  { %v709_v59 = vpop.f32.mrf.mxu1  ;;  %v676_v11 = vadd.f32 %v675_v58, %v674_v56  ;;  %v505_v22 = vadd.f32 %v707_v16, %v448_v10 }
  0xeb   :  { %v677_v60 = vpop.f32.mrf.mxu0  ;;  %v710_v27 = vadd.f32 %v709_v59, %v708_v57 }
  0xec   :  { %v711_v61 = vpop.f32.mrf.mxu1  ;;  %v451_v20 = vadd.f32 %v676_v11, %v600_v5 }
  0xed   :  { %v678_v62 = vpop.f32.mrf.mxu0 }
  0xee   :  { %v712_v63 = vpop.f32.mrf.mxu1  ;;  %v679_v6 = vadd.f32 %v678_v62, %v677_v60  ;;  %v508_v35 = vadd.f32 %v710_v27, %v451_v20 }
  0xef   :  { %v680_v0 = vpop.f32.mrf.mxu0  ;;  %v713_v18 = vadd.f32 %v712_v63, %v711_v61 }
  0xf0   :  { %v714_v1 = vpop.f32.mrf.mxu1  ;;  %v456_v13 = vadd.f32 %v679_v6, %v600_v5 }
  0xf1   :  { %v681_v2 = vpop.f32.mrf.mxu0 }
  0xf2   :  { %v715_v4 = vpop.f32.mrf.mxu1  ;;  %v682_v14 = vadd.f32 %v681_v2, %v680_v0  ;;  %v513_v26 = vadd.f32 %v713_v18, %v456_v13 }
  0xf3   :  { %v683_v7 = vpop.f32.mrf.mxu0  ;;  %v716_v30 = vadd.f32 %v715_v4, %v714_v1 }
  0xf4   :  { %v717_v8 = vpop.f32.mrf.mxu1  ;;  %v459_v23 = vadd.f32 %v682_v14, %v600_v5 }
  0xf5   :  { %v684_v9 = vpop.f32.mrf.mxu0 }
  0xf6   :  { %v718_v12 = vpop.f32.mrf.mxu1  ;;  %v685_v24 = vadd.f32 %v684_v9, %v683_v7  ;;  %v516_v40 = vadd.f32 %v716_v30, %v459_v23 }
  0xf7   :  { %v686_v15 = vpop.f32.mrf.mxu0  ;;  %v719_v43 = vadd.f32 %v718_v12, %v717_v8 }
  0xf8   :  { %v720_v17 = vpop.f32.mrf.mxu1  ;;  %v464_v36 = vadd.f32 %v685_v24, %v600_v5 }
  0xf9   :  { %v687_v19 = vpop.f32.mrf.mxu0 }
  0xfa   :  { %v721_v21 = vpop.f32.mrf.mxu1  ;;  %v688_v37 = vadd.f32 %v687_v19, %v686_v15  ;;  %v521_v50 = vadd.f32 %v719_v43, %v464_v36 }
  0xfb   :  { %v561_v25 = vpop.f32.mrf.mxu0  ;;  %v722_v52 = vadd.f32 %v721_v21, %v720_v17 }
  0xfc   :  { %v562_v28 = vadd.f32 %v561_v25, %v505_v22  ;;  %v569_v29 = vpop.f32.mrf.mxu1  ;;  %v467_v48 = vadd.f32 %v688_v37, %v600_v5 }
  0xfd   :  { %v570_v31 = vadd.f32 %v569_v29, %v513_v26  ;;  %v740_v32 = vpop.f32.mrf.mxu0 }
  0xfe   :  { %v584_v33 = vmax.f32 %v562_v28, 0.0  ;;  %v744_v34 = vpop.f32.mrf.mxu1  ;;  %v524_v56 = vadd.f32 %v722_v52, %v467_v48 }
  0xff   :  { %v586_v38 = vmax.f32 %v570_v31, 0.0  ;;  %v564_v39 = vpop.f32.mrf.mxu0 }
 0x100   :  { %590 = vst [vmem:[%s1016_s3] sm:$0xff] %v584_v33  ;;  %v565_v41 = vadd.f32 %v564_v39, %v508_v35  ;;  %v572_v42 = vpop.f32.mrf.mxu1 }
 0x101   :  { %592 = vst [vmem:[%s1016_s3 + $0x10] sm:$0xff] %v586_v38  ;;  %v573_v44 = vadd.f32 %v572_v42, %v516_v40  ;;  %v741_v45 = vpop.f32.mrf.mxu0 }
 0x102   :  { %v585_v46 = vmax.f32 %v565_v41, 0.0  ;;  %v745_v47 = vpop.f32.mrf.mxu1 }
 0x103   :  { %v587_v49 = vmax.f32 %v573_v44, 0.0 }
 0x104   :  { %591 = vst [vmem:[%s1016_s3 + $0x8] sm:$0xff] %v585_v46  ;;  %v577_v51 = vpop.f32.mrf.mxu1 }
 0x105   :  { %593 = vst [vmem:[%s1016_s3 + $0x18] sm:$0xff] %v587_v49  ;;  %v578_v53 = vadd.f32 %v577_v51, %v521_v50 }
 0x106   :  { %v748_v54 = vpop.f32.mrf.mxu1 }
 0x107   :  { %v588_v55 = vmax.f32 %v578_v53, 0.0 }
 0x108   :  { %v580_v57 = vpop.f32.mrf.mxu1 }
 0x109   :  { %594 = vst [vmem:[%s1016_s3 + $0x20] sm:$0xff] %v588_v55  ;;  %v581_v58 = vadd.f32 %v580_v57, %v524_v56 }
 0x10a   :  { %v749_v59 = vpop.f32.mrf.mxu1 }
 0x10b   :  { %v589_v60 = vmax.f32 %v581_v58, 0.0 }
 0x10d   :  { %595 = vst [vmem:[%s1016_s3 + $0x28] sm:$0xff] %v589_v60 }

</bundles_post_ra>
